<compile_context>
chip_gen: v6e
topology: v6e:2x2x1
jax: 0.10.0
libtpu: 0.0.40
codegen_flags: <defaults>
</compile_context>

<pallas_src>
import numpy as np
import jax
import jax.numpy as jnp
from jax.experimental import pallas as pl
from jax.experimental.pallas import tpu as pltpu

# ----------------- scaled-down config (real module: sr=48000, f_min=20, f_max=20000,
# mlp_out_dim=256 -> tau_max=2400, frame=4800; scaled so shapes stay small) ----------
SR = 4800
F_MIN = 100.0
F_MAX = 2400.0
THRESHOLD = 0.1                       # torchyin default
FRAME_STRIDE_S = 0.01                 # torchyin default

TAU_MIN = int(SR / F_MAX)             # 2
TAU_MAX = int(SR / F_MIN)             # 48
FRAME_LEN = 2 * TAU_MAX               # 96
STRIDE = int(FRAME_STRIDE_S * SR)     # 48
FFT_SIZE = int(2 ** (np.ceil(np.log2(FRAME_LEN)) + 1))   # torchyin fft size (256)
N_FREQS = FFT_SIZE // 2 + 1           # 129
NF_PAD = ((N_FREQS + 127) // 128) * 128                   # 256 (lane-aligned)
NCM = TAU_MAX - 1 - TAU_MIN           # cmdf length (45)
TAU_PAD = 128                         # lane-dense width of the cmdf/search pipeline
L_PAD = 128                           # frame length padded to a full MXU K tile

MLP_OUT = 128                         # scaled down from 256 (lane-dense output)
MLP_LAYERS = 3
LN_EPS = 1e-5
NEG_SLOPE = 0.01

ROW_ALIGN = 16                        # bf16 sublane packing
TR_TARGET = 256                       # row tile target; sweep {128, 256, 512}

assert NCM <= TAU_PAD and TAU_PAD % 128 == 0


def _round_up(x, m):
    return ((x + m - 1) // m) * m


def _vmem_budget_bytes(tr):
    """Explicit VMEM budget (don't request the whole 64 MiB on v7x)."""
    bf, f4 = 2, 4
    tiles = 2 * (tr * L_PAD * bf + tr * MLP_OUT * f4)            # double-buffered I/O tiles
    tables = 2 * (L_PAD * 2 * NF_PAD * bf + (NF_PAD + L_PAD) * 2 * TAU_PAD * bf)
    weights = 2 * ((MLP_LAYERS - 1) * MLP_OUT * MLP_OUT * bf + 10 * MLP_OUT * f4)
    interm = tr * (2 * NF_PAD + NF_PAD + 2 * L_PAD + (NF_PAD + L_PAD)
                   + 2 * TAU_PAD + 6 * TAU_PAD + 4 * MLP_OUT) * f4
    est = tiles + tables + weights + interm
    return int(min(32 << 20, 2 * est + (4 << 20)))


# ---------------------------------------------------------------------------
# Fused kernel: YIN pitch per frame + MLP head.  Rows = frames (B*T).
# ---------------------------------------------------------------------------
def pitch_mlp_kernel(frames_ref, dftcs_ref, rhs2_ref,
                     w1_ref, b1_ref, g1_ref, e1_ref,
                     w2_ref, b2_ref, g2_ref, e2_ref,
                     w3_ref, b3_ref, g3_ref, e3_ref,
                     o_ref):
    x = frames_ref[...]                                            # (TR, L_PAD) bf16
    tr = x.shape[0]

    # ---- autocorrelation via zero-padded rDFT: one cos|sin matmul, bf16 in / f32 acc
    reim = jnp.dot(x, dftcs_ref[...], preferred_element_type=jnp.float32)  # (TR, 2*NF_PAD)
    re = reim[:, :NF_PAD]
    im = reim[:, NF_PAD:]
    power = re * re + im * im                                      # (TR, NF_PAD) f32
    xsq = jnp.square(x.astype(jnp.float32))                        # (TR, L_PAD)  f32

    # ---- difference function + CMNDF in ONE matmul: the -2*irfft matrix, the energy
    # matrix, the tau scaling, the cumulative sum and the TAU_MIN offset are all folded
    # into the host-built rhs2 table.  Output: two lane-aligned 128-wide blocks.
    lhs2 = jnp.concatenate([power, xsq], axis=-1).astype(jnp.bfloat16)      # (TR, 384)
    big = jnp.dot(lhs2, rhs2_ref[...], preferred_element_type=jnp.float32)  # (TR, 2*TAU_PAD)
    num = big[:, :TAU_PAD]                 # tau * diff[tau]        (cols >= NCM are zero pad)
    den = big[:, TAU_PAD:]                 # cumsum_{t=1..tau} diff[t]
    # NOTE: the clamp deviates from torchyin's raw cumulative-sum division only for
    # silent/all-zero frames (torchyin -> nan/0 propagation, here -> cmdf=0, pitch=0).
    cmdf = num / jnp.maximum(den, 1e-5)                            # (TR, TAU_PAD)

    # ---- search (replicates torchyin._search argmax-of-bool semantics), lane-dense
    iota = jax.lax.broadcasted_iota(jnp.int32, (tr, TAU_PAD), 1)
    iota_f = iota.astype(jnp.float32)
    valid = iota < NCM
    big_c = jnp.float32(TAU_PAD + TAU_MAX + 7)

    below = jnp.logical_and(cmdf < THRESHOLD, valid)
    fb = jnp.min(jnp.where(below, iota_f, big_c), axis=-1, keepdims=True)
    fb = jnp.where(fb < big_c, fb, 0.0)        # torch argmax: 0 if none below
    fb = jnp.where(fb > 0.0, fb, jnp.float32(TAU_MAX))
    beyond = iota_f >= fb

    nxt = jnp.concatenate([cmdf[:, 1:], cmdf[:, -1:]], axis=-1)    # cmdf shifted left by 1
    increasing = jnp.logical_or(iota >= NCM - 1, (nxt - cmdf) >= 0.0)

    mask = jnp.logical_and(jnp.logical_and(beyond, increasing), valid)
    ti = jnp.min(jnp.where(mask, iota_f, big_c), axis=-1, keepdims=True)
    ti = jnp.where(ti < big_c, ti, 0.0)        # torch argmax: 0 if no hit
    period = ti + jnp.float32(TAU_MIN + 1)
    pitch = jnp.where(ti > 0.0, jnp.float32(SR) / period, 0.0)     # (TR, 1)

    # ---- MLP head: [Linear -> LayerNorm -> LeakyReLU] x 3, dims 1->H->H->H
    def ln(v, g_ref, b_ref):
        mu = jnp.mean(v, axis=-1, keepdims=True)
        m2 = jnp.mean(v * v, axis=-1, keepdims=True)               # one-pass E[x], E[x^2]
        return (v - mu) * jax.lax.rsqrt(m2 - mu * mu + LN_EPS) * g_ref[...] + b_ref[...]

    def lrelu(v):
        return jnp.where(v >= 0.0, v, NEG_SLOPE * v)

    # Linear(1 -> H) as a VPU broadcast (avoid a K=1 contraction on the MXU).
    h = pitch * w1_ref[...] + b1_ref[...]                          # (TR, H) f32
    h = lrelu(ln(h, g1_ref, e1_ref))
    h = lrelu(ln(jnp.dot(h.astype(jnp.bfloat16), w2_ref[...],
                         preferred_element_type=jnp.float32) + b2_ref[...], g2_ref, e2_ref))
    h = lrelu(ln(jnp.dot(h.astype(jnp.bfloat16), w3_ref[...],
                         preferred_element_type=jnp.float32) + b3_ref[...], g3_ref, e3_ref))
    o_ref[...] = h


# ---------------------------------------------------------------------------
# Host-side constant tables (built in f64, cast to bf16 at the end).
# ---------------------------------------------------------------------------
def build_yin_tables():
    L, Lp, N, NF = FRAME_LEN, L_PAD, FFT_SIZE, N_FREQS
    j = np.arange(L, dtype=np.float64)
    k = np.arange(NF, dtype=np.float64)
    t_all = np.arange(TAU_MAX, dtype=np.float64)

    # forward rDFT of the zero-padded frame, cos|sin concatenated, both axes padded.
    ang = 2.0 * np.pi * np.outer(j, k) / N
    dftcs = np.zeros((Lp, 2 * NF_PAD))
    dftcs[:L, :NF] = np.cos(ang)
    dftcs[:L, NF_PAD:NF_PAD + NF] = np.sin(ang)

    # inverse rDFT (cosine) matrix for a real, even power spectrum: corr[tau].
    w = np.full(NF, 2.0)
    w[0] = 1.0
    if N % 2 == 0:
        w[-1] = 1.0
    irfft_c = (w[:, None] * np.cos(2.0 * np.pi * np.outer(k, t_all) / N)) / N   # (NF, TAU_MAX)

    # energy matrix: r0 + r_tau = xsq @ emat,  emat[j,tau] = 1 + [tau <= j <= L-1-tau]
    jj = np.arange(L)[:, None]
    tt = np.arange(TAU_MAX)[None, :]
    emat = 1.0 + ((tt <= jj) & (jj <= (L - 1 - tt))).astype(np.float64)          # (L, TAU_MAX)

    # raw difference function columns:  diff[tau] = [power | xsq] @ dcol[:, tau]
    dcol = np.zeros((NF_PAD + Lp, TAU_MAX))
    dcol[:NF, :] = -2.0 * irfft_c
    dcol[NF_PAD:NF_PAD + L, :] = emat

    # fused CMNDF table over the selected taus (tau = TAU_MIN+1 .. TAU_MAX-1):
    #   num[:, c] = tau_c * diff[tau_c]          (tau factor folded in)
    #   den[:, c] = sum_{t=1..tau_c} diff[t]     (cumulative sum + TAU_MIN offset folded in)
    # so cmdf = num / max(den, 1e-5)  ==  diff[1:]*tau / max(cumsum(diff[1:]), 1e-5)[TAU_MIN:]
    taus = np.arange(TAU_MIN + 1, TAU_MAX)                     # length NCM
    rhs2 = np.zeros((NF_PAD + Lp, 2 * TAU_PAD))
    rhs2[:, :NCM] = dcol[:, taus] * taus[None, :].astype(np.float64)
    csum_cols = np.cumsum(dcol[:, 1:], axis=1)                 # col j = sum_{t=1..j+1} dcol[:,t]
    rhs2[:, TAU_PAD:TAU_PAD + NCM] = csum_cols[:, taus - 1]

    return (jnp.asarray(dftcs, jnp.bfloat16), jnp.asarray(rhs2, jnp.bfloat16))


def init_params(key):
    def uni(k, shape, scale, dtype=jnp.float32):
        return jax.random.uniform(k, shape, jnp.float32, -scale, scale).astype(dtype)

    keys = jax.random.split(key, 2 * MLP_LAYERS)
    # layer 1: Linear(1 -> H) stored as a (1, H) f32 row (VPU broadcast).
    mlp = [uni(keys[0], (1, MLP_OUT), 1.0), uni(keys[1], (1, MLP_OUT), 1.0),
           jnp.ones((1, MLP_OUT), jnp.float32), jnp.zeros((1, MLP_OUT), jnp.float32)]
    s = 1.0 / float(np.sqrt(MLP_OUT))
    for i in range(1, MLP_LAYERS):
        mlp += [uni(keys[2 * i], (MLP_OUT, MLP_OUT), s, jnp.bfloat16),   # MXU weights in bf16
                uni(keys[2 * i + 1], (1, MLP_OUT), s),
                jnp.ones((1, MLP_OUT), jnp.float32),
                jnp.zeros((1, MLP_OUT), jnp.float32)]
    return {"mlp": tuple(mlp)}


# ---------------------------------------------------------------------------
# Wrapper: framing (torchyin unfold) + single fused pallas_call.
# ---------------------------------------------------------------------------
def pitch_encoder_forward(y, params, tables):
    dftcs, rhs2 = tables
    B, n = y.shape
    if n < FRAME_LEN:                         # torchyin pads to at least one frame
        y = jnp.pad(y, ((0, 0), (0, FRAME_LEN - n)))
        n = FRAME_LEN
    T = 1 + (n - FRAME_LEN) // STRIDE
    idx = (np.arange(T) * STRIDE)[:, None] + np.arange(FRAME_LEN)[None, :]
    frames = y[:, idx].reshape(B * T, FRAME_LEN).astype(jnp.float32)

    R = B * T
    TR = min(TR_TARGET, _round_up(R, ROW_ALIGN))
    if R > ROW_ALIGN and _round_up(R, TR) // TR < 2:
        # keep >= 2 grid steps so the "parallel" axis can shard over v7x's 2 TensorCores
        TR = _round_up((R + 1) // 2, ROW_ALIGN)
    Rp = _round_up(R, TR)

    # pad rows to the tile grid and the frame length to a full 128-lane K tile; bf16 input.
    frames = jnp.pad(frames, ((0, Rp - R), (0, L_PAD - FRAME_LEN))).astype(jnp.bfloat16)

    def full_spec(a):
        return pl.BlockSpec(a.shape, lambda i: (0, 0))

    mlp = params["mlp"]
    out = pl.pallas_call(
        pitch_mlp_kernel,
        out_shape=jax.ShapeDtypeStruct((Rp, MLP_OUT), jnp.float32),
        grid_spec=pltpu.PrefetchScalarGridSpec(
            num_scalar_prefetch=0,
            grid=(Rp // TR,),
            in_specs=[pl.BlockSpec((TR, L_PAD), lambda i: (i, 0)),
                      full_spec(dftcs), full_spec(rhs2)]
                     + [full_spec(a) for a in mlp],
            out_specs=pl.BlockSpec((TR, MLP_OUT), lambda i: (i, 0)),
        ),
        compiler_params=pltpu.CompilerParams(
            dimension_semantics=("parallel",),
            vmem_limit_bytes=_vmem_budget_bytes(TR)),
    )(frames, dftcs, rhs2, *mlp)

    return out[:R].reshape(B, T, MLP_OUT)


if __name__ == "__main__":
    key = jax.random.PRNGKey(0)
    k_audio, k_params = jax.random.split(key)

    B = 2
    N_SAMPLES = FRAME_LEN + 16 * STRIDE        # -> T = 17 frames
    y = jax.random.normal(k_audio, (B, N_SAMPLES), jnp.float32)

    params = init_params(k_params)
    tables = build_yin_tables()

    out = jax.block_until_ready(pitch_encoder_forward(y, params, tables))

    T = 1 + (N_SAMPLES - FRAME_LEN) // STRIDE
    assert out.shape == (B, T, MLP_OUT)
    assert bool(jnp.all(jnp.isfinite(out)))
    print("KERNEL_OK")
</pallas_src>

<mosaic_0001>
module attributes {stable_mosaic.version = 11 : i64} {
  func.func @pitch_mlp_kernel(%arg0: i32, %arg1: memref<32x128xbf16, #tpu.memory_space<vmem>>, %arg2: memref<128x512xbf16, #tpu.memory_space<vmem>>, %arg3: memref<384x256xbf16, #tpu.memory_space<vmem>>, %arg4: memref<1x128xf32, #tpu.memory_space<vmem>>, %arg5: memref<1x128xf32, #tpu.memory_space<vmem>>, %arg6: memref<1x128xf32, #tpu.memory_space<vmem>>, %arg7: memref<1x128xf32, #tpu.memory_space<vmem>>, %arg8: memref<128x128xbf16, #tpu.memory_space<vmem>>, %arg9: memref<1x128xf32, #tpu.memory_space<vmem>>, %arg10: memref<1x128xf32, #tpu.memory_space<vmem>>, %arg11: memref<1x128xf32, #tpu.memory_space<vmem>>, %arg12: memref<128x128xbf16, #tpu.memory_space<vmem>>, %arg13: memref<1x128xf32, #tpu.memory_space<vmem>>, %arg14: memref<1x128xf32, #tpu.memory_space<vmem>>, %arg15: memref<1x128xf32, #tpu.memory_space<vmem>>, %arg16: memref<32x128xf32, #tpu.memory_space<vmem>>) attributes {dimension_semantics = [#tpu.dimension_semantics<parallel>], iteration_bounds = array<i64: 2>, scalar_prefetch = 0 : i64, scratch_operands = 0 : i64, tpu.core_type = #tpu.core_type<tc>, window_params = [{transform_indices = @transform_0, window_bounds = array<i64: 32, 128>}, {pipeline_mode = #tpu.pipeline_mode<synchronous>, transform_indices = @transform_1, window_bounds = array<i64: 128, 512>}, {pipeline_mode = #tpu.pipeline_mode<synchronous>, transform_indices = @transform_2, window_bounds = array<i64: 384, 256>}, {pipeline_mode = #tpu.pipeline_mode<synchronous>, transform_indices = @transform_3, window_bounds = array<i64: 1, 128>}, {pipeline_mode = #tpu.pipeline_mode<synchronous>, transform_indices = @transform_4, window_bounds = array<i64: 1, 128>}, {pipeline_mode = #tpu.pipeline_mode<synchronous>, transform_indices = @transform_5, window_bounds = array<i64: 1, 128>}, {pipeline_mode = #tpu.pipeline_mode<synchronous>, transform_indices = @transform_6, window_bounds = array<i64: 1, 128>}, {pipeline_mode = #tpu.pipeline_mode<synchronous>, transform_indices = @transform_7, window_bounds = array<i64: 128, 128>}, {pipeline_mode = #tpu.pipeline_mode<synchronous>, transform_indices = @transform_8, window_bounds = array<i64: 1, 128>}, {pipeline_mode = #tpu.pipeline_mode<synchronous>, transform_indices = @transform_9, window_bounds = array<i64: 1, 128>}, {pipeline_mode = #tpu.pipeline_mode<synchronous>, transform_indices = @transform_10, window_bounds = array<i64: 1, 128>}, {pipeline_mode = #tpu.pipeline_mode<synchronous>, transform_indices = @transform_11, window_bounds = array<i64: 128, 128>}, {pipeline_mode = #tpu.pipeline_mode<synchronous>, transform_indices = @transform_12, window_bounds = array<i64: 1, 128>}, {pipeline_mode = #tpu.pipeline_mode<synchronous>, transform_indices = @transform_13, window_bounds = array<i64: 1, 128>}, {pipeline_mode = #tpu.pipeline_mode<synchronous>, transform_indices = @transform_14, window_bounds = array<i64: 1, 128>}, {transform_indices = @transform_15, window_bounds = array<i64: 32, 128>}]} {
    %c0 = arith.constant 0 : index
    %c0_0 = arith.constant 0 : index
    %0 = vector.load %arg1[%c0, %c0_0] : memref<32x128xbf16, #tpu.memory_space<vmem>>, vector<32x128xbf16>
    %c0_1 = arith.constant 0 : index
    %c0_2 = arith.constant 0 : index
    %1 = vector.load %arg2[%c0_1, %c0_2] : memref<128x512xbf16, #tpu.memory_space<vmem>>, vector<128x512xbf16>
    %cst = arith.constant dense<0.000000e+00> : vector<32x512xf32>
    %2 = tpu.matmul %0, %1, %cst {dimension_numbers = #tpu.dot_dimension_numbers<[1], [0], [0], [1], [0, 0, 1, 1], [], []>} : vector<32x128xbf16>, vector<128x512xbf16>, vector<32x512xf32> -> vector<32x512xf32>
    %3 = vector.extract_strided_slice %2 {offsets = [0, 0], sizes = [32, 256], strides = [1, 1]} : vector<32x512xf32> to vector<32x256xf32>
    %4 = vector.extract_strided_slice %2 {offsets = [0, 256], sizes = [32, 256], strides = [1, 1]} : vector<32x512xf32> to vector<32x256xf32>
    %5 = arith.mulf %3, %3 : vector<32x256xf32>
    %6 = arith.mulf %4, %4 : vector<32x256xf32>
    %7 = arith.addf %5, %6 : vector<32x256xf32>
    %8 = arith.extf %0 : vector<32x128xbf16> to vector<32x128xf32>
    %9 = arith.mulf %8, %8 : vector<32x128xf32>
    %10 = tpu.concatenate %7, %9 in 1 : vector<32x256xf32>, vector<32x128xf32> -> vector<32x384xf32>
    %11 = arith.truncf %10 : vector<32x384xf32> to vector<32x384xbf16>
    %c0_3 = arith.constant 0 : index
    %c0_4 = arith.constant 0 : index
    %12 = vector.load %arg3[%c0_3, %c0_4] : memref<384x256xbf16, #tpu.memory_space<vmem>>, vector<384x256xbf16>
    %cst_5 = arith.constant dense<0.000000e+00> : vector<32x256xf32>
    %13 = tpu.matmul %11, %12, %cst_5 {dimension_numbers = #tpu.dot_dimension_numbers<[1], [0], [0], [1], [0, 0, 1, 1], [], []>} : vector<32x384xbf16>, vector<384x256xbf16>, vector<32x256xf32> -> vector<32x256xf32>
    %14 = vector.extract_strided_slice %13 {offsets = [0, 0], sizes = [32, 128], strides = [1, 1]} : vector<32x256xf32> to vector<32x128xf32>
    %15 = vector.extract_strided_slice %13 {offsets = [0, 128], sizes = [32, 128], strides = [1, 1]} : vector<32x256xf32> to vector<32x128xf32>
    %cst_6 = arith.constant 9.99999974E-6 : f32
    %16 = vector.broadcast %cst_6 : f32 to vector<32x128xf32>
    %17 = arith.maximumf %15, %16 : vector<32x128xf32>
    %18 = arith.divf %14, %17 : vector<32x128xf32>
    %19 = tpu.iota {dimensions = array<i32: 1>} : vector<32x128xi32>
    %20 = arith.sitofp %19 : vector<32x128xi32> to vector<32x128xf32>
    %c45_i32 = arith.constant 45 : i32
    %21 = vector.broadcast %c45_i32 : i32 to vector<32x128xi32>
    %22 = arith.cmpi slt, %19, %21 : vector<32x128xi32>
    %cst_7 = arith.constant 1.000000e-01 : f32
    %23 = vector.broadcast %cst_7 : f32 to vector<32x128xf32>
    %24 = arith.cmpf olt, %18, %23 : vector<32x128xf32>
    %25 = arith.andi %24, %22 : vector<32x128xi1>
    %cst_8 = arith.constant 1.830000e+02 : f32
    %26 = vector.broadcast %cst_8 : f32 to vector<32x128xf32>
    %27 = arith.select %25, %20, %26 : vector<32x128xi1>, vector<32x128xf32>
    %cst_9 = arith.constant dense<0x7F800000> : vector<32xf32>
    %28 = vector.multi_reduction <minimumf>, %27, %cst_9 [1] : vector<32x128xf32> to vector<32xf32>
    %29 = vector.shape_cast %28 : vector<32xf32> to vector<32x1xf32>
    %cst_10 = arith.constant 1.830000e+02 : f32
    %30 = vector.broadcast %cst_10 : f32 to vector<32x1xf32>
    %31 = arith.cmpf olt, %29, %30 : vector<32x1xf32>
    %cst_11 = arith.constant 0.000000e+00 : f32
    %32 = vector.broadcast %cst_11 : f32 to vector<32x1xf32>
    %33 = arith.select %31, %29, %32 : vector<32x1xi1>, vector<32x1xf32>
    %cst_12 = arith.constant 0.000000e+00 : f32
    %34 = vector.broadcast %cst_12 : f32 to vector<32x1xf32>
    %35 = arith.cmpf ogt, %33, %34 : vector<32x1xf32>
    %cst_13 = arith.constant 4.800000e+01 : f32
    %36 = vector.broadcast %cst_13 : f32 to vector<32x1xf32>
    %37 = arith.select %35, %33, %36 : vector<32x1xi1>, vector<32x1xf32>
    %38 = vector.broadcast %37 : vector<32x1xf32> to vector<32x128xf32>
    %39 = arith.cmpf oge, %20, %38 : vector<32x128xf32>
    %40 = vector.extract_strided_slice %18 {offsets = [0, 1], sizes = [32, 127], strides = [1, 1]} : vector<32x128xf32> to vector<32x127xf32>
    %41 = vector.extract_strided_slice %18 {offsets = [0, 127], sizes = [32, 1], strides = [1, 1]} : vector<32x128xf32> to vector<32x1xf32>
    %42 = tpu.concatenate %40, %41 in 1 : vector<32x127xf32>, vector<32x1xf32> -> vector<32x128xf32>
    %c44_i32 = arith.constant 44 : i32
    %43 = vector.broadcast %c44_i32 : i32 to vector<32x128xi32>
    %44 = arith.cmpi sge, %19, %43 : vector<32x128xi32>
    %45 = arith.subf %42, %18 : vector<32x128xf32>
    %cst_14 = arith.constant 0.000000e+00 : f32
    %46 = vector.broadcast %cst_14 : f32 to vector<32x128xf32>
    %47 = arith.cmpf oge, %45, %46 : vector<32x128xf32>
    %48 = arith.ori %44, %47 : vector<32x128xi1>
    %49 = arith.andi %39, %48 : vector<32x128xi1>
    %50 = arith.andi %49, %22 : vector<32x128xi1>
    %cst_15 = arith.constant 1.830000e+02 : f32
    %51 = vector.broadcast %cst_15 : f32 to vector<32x128xf32>
    %52 = arith.select %50, %20, %51 : vector<32x128xi1>, vector<32x128xf32>
    %cst_16 = arith.constant dense<0x7F800000> : vector<32xf32>
    %53 = vector.multi_reduction <minimumf>, %52, %cst_16 [1] : vector<32x128xf32> to vector<32xf32>
    %54 = vector.shape_cast %53 : vector<32xf32> to vector<32x1xf32>
    %cst_17 = arith.constant 1.830000e+02 : f32
    %55 = vector.broadcast %cst_17 : f32 to vector<32x1xf32>
    %56 = arith.cmpf olt, %54, %55 : vector<32x1xf32>
    %cst_18 = arith.constant 0.000000e+00 : f32
    %57 = vector.broadcast %cst_18 : f32 to vector<32x1xf32>
    %58 = arith.select %56, %54, %57 : vector<32x1xi1>, vector<32x1xf32>
    %cst_19 = arith.constant 3.000000e+00 : f32
    %59 = vector.broadcast %cst_19 : f32 to vector<32x1xf32>
    %60 = arith.addf %58, %59 : vector<32x1xf32>
    %cst_20 = arith.constant 0.000000e+00 : f32
    %61 = vector.broadcast %cst_20 : f32 to vector<32x1xf32>
    %62 = arith.cmpf ogt, %58, %61 : vector<32x1xf32>
    %cst_21 = arith.constant 4.800000e+03 : f32
    %63 = vector.broadcast %cst_21 : f32 to vector<32x1xf32>
    %64 = arith.divf %63, %60 : vector<32x1xf32>
    %cst_22 = arith.constant 0.000000e+00 : f32
    %65 = vector.broadcast %cst_22 : f32 to vector<32x1xf32>
    %66 = arith.select %62, %64, %65 : vector<32x1xi1>, vector<32x1xf32>
    %c0_23 = arith.constant 0 : index
    %c0_24 = arith.constant 0 : index
    %67 = vector.load %arg4[%c0_23, %c0_24] : memref<1x128xf32, #tpu.memory_space<vmem>>, vector<1x128xf32>
    %68 = vector.broadcast %66 : vector<32x1xf32> to vector<32x128xf32>
    %69 = vector.broadcast %67 : vector<1x128xf32> to vector<32x128xf32>
    %70 = arith.mulf %68, %69 : vector<32x128xf32>
    %c0_25 = arith.constant 0 : index
    %c0_26 = arith.constant 0 : index
    %71 = vector.load %arg5[%c0_25, %c0_26] : memref<1x128xf32, #tpu.memory_space<vmem>>, vector<1x128xf32>
    %72 = vector.broadcast %71 : vector<1x128xf32> to vector<32x128xf32>
    %73 = arith.addf %70, %72 : vector<32x128xf32>
    %cst_27 = arith.constant dense<0.000000e+00> : vector<32xf32>
    %74 = vector.multi_reduction <add>, %73, %cst_27 [1] : vector<32x128xf32> to vector<32xf32>
    %75 = vector.shape_cast %74 : vector<32xf32> to vector<32x1xf32>
    %cst_28 = arith.constant 1.280000e+02 : f32
    %76 = vector.broadcast %cst_28 : f32 to vector<32x1xf32>
    %77 = arith.divf %75, %76 : vector<32x1xf32>
    %78 = arith.mulf %73, %73 : vector<32x128xf32>
    %cst_29 = arith.constant dense<0.000000e+00> : vector<32xf32>
    %79 = vector.multi_reduction <add>, %78, %cst_29 [1] : vector<32x128xf32> to vector<32xf32>
    %80 = vector.shape_cast %79 : vector<32xf32> to vector<32x1xf32>
    %cst_30 = arith.constant 1.280000e+02 : f32
    %81 = vector.broadcast %cst_30 : f32 to vector<32x1xf32>
    %82 = arith.divf %80, %81 : vector<32x1xf32>
    %83 = vector.broadcast %77 : vector<32x1xf32> to vector<32x128xf32>
    %84 = arith.subf %73, %83 : vector<32x128xf32>
    %85 = arith.mulf %77, %77 : vector<32x1xf32>
    %86 = arith.subf %82, %85 : vector<32x1xf32>
    %cst_31 = arith.constant 9.99999974E-6 : f32
    %87 = vector.broadcast %cst_31 : f32 to vector<32x1xf32>
    %88 = arith.addf %86, %87 : vector<32x1xf32>
    %89 = math.rsqrt %88 : vector<32x1xf32>
    %90 = vector.broadcast %89 : vector<32x1xf32> to vector<32x128xf32>
    %91 = arith.mulf %84, %90 : vector<32x128xf32>
    %c0_32 = arith.constant 0 : index
    %c0_33 = arith.constant 0 : index
    %92 = vector.load %arg6[%c0_32, %c0_33] : memref<1x128xf32, #tpu.memory_space<vmem>>, vector<1x128xf32>
    %93 = vector.broadcast %92 : vector<1x128xf32> to vector<32x128xf32>
    %94 = arith.mulf %91, %93 : vector<32x128xf32>
    %c0_34 = arith.constant 0 : index
    %c0_35 = arith.constant 0 : index
    %95 = vector.load %arg7[%c0_34, %c0_35] : memref<1x128xf32, #tpu.memory_space<vmem>>, vector<1x128xf32>
    %96 = vector.broadcast %95 : vector<1x128xf32> to vector<32x128xf32>
    %97 = arith.addf %94, %96 : vector<32x128xf32>
    %cst_36 = arith.constant 0.000000e+00 : f32
    %98 = vector.broadcast %cst_36 : f32 to vector<32x128xf32>
    %99 = arith.cmpf oge, %97, %98 : vector<32x128xf32>
    %cst_37 = arith.constant 0.00999999977 : f32
    %100 = vector.broadcast %cst_37 : f32 to vector<32x128xf32>
    %101 = arith.mulf %100, %97 : vector<32x128xf32>
    %102 = arith.select %99, %97, %101 : vector<32x128xi1>, vector<32x128xf32>
    %103 = arith.truncf %102 : vector<32x128xf32> to vector<32x128xbf16>
    %c0_38 = arith.constant 0 : index
    %c0_39 = arith.constant 0 : index
    %104 = vector.load %arg8[%c0_38, %c0_39] : memref<128x128xbf16, #tpu.memory_space<vmem>>, vector<128x128xbf16>
    %cst_40 = arith.constant dense<0.000000e+00> : vector<32x128xf32>
    %105 = tpu.matmul %103, %104, %cst_40 {dimension_numbers = #tpu.dot_dimension_numbers<[1], [0], [0], [1], [0, 0, 1, 1], [], []>} : vector<32x128xbf16>, vector<128x128xbf16>, vector<32x128xf32> -> vector<32x128xf32>
    %c0_41 = arith.constant 0 : index
    %c0_42 = arith.constant 0 : index
    %106 = vector.load %arg9[%c0_41, %c0_42] : memref<1x128xf32, #tpu.memory_space<vmem>>, vector<1x128xf32>
    %107 = vector.broadcast %106 : vector<1x128xf32> to vector<32x128xf32>
    %108 = arith.addf %105, %107 : vector<32x128xf32>
    %cst_43 = arith.constant dense<0.000000e+00> : vector<32xf32>
    %109 = vector.multi_reduction <add>, %108, %cst_43 [1] : vector<32x128xf32> to vector<32xf32>
    %110 = vector.shape_cast %109 : vector<32xf32> to vector<32x1xf32>
    %cst_44 = arith.constant 1.280000e+02 : f32
    %111 = vector.broadcast %cst_44 : f32 to vector<32x1xf32>
    %112 = arith.divf %110, %111 : vector<32x1xf32>
    %113 = arith.mulf %108, %108 : vector<32x128xf32>
    %cst_45 = arith.constant dense<0.000000e+00> : vector<32xf32>
    %114 = vector.multi_reduction <add>, %113, %cst_45 [1] : vector<32x128xf32> to vector<32xf32>
    %115 = vector.shape_cast %114 : vector<32xf32> to vector<32x1xf32>
    %cst_46 = arith.constant 1.280000e+02 : f32
    %116 = vector.broadcast %cst_46 : f32 to vector<32x1xf32>
    %117 = arith.divf %115, %116 : vector<32x1xf32>
    %118 = vector.broadcast %112 : vector<32x1xf32> to vector<32x128xf32>
    %119 = arith.subf %108, %118 : vector<32x128xf32>
    %120 = arith.mulf %112, %112 : vector<32x1xf32>
    %121 = arith.subf %117, %120 : vector<32x1xf32>
    %cst_47 = arith.constant 9.99999974E-6 : f32
    %122 = vector.broadcast %cst_47 : f32 to vector<32x1xf32>
    %123 = arith.addf %121, %122 : vector<32x1xf32>
    %124 = math.rsqrt %123 : vector<32x1xf32>
    %125 = vector.broadcast %124 : vector<32x1xf32> to vector<32x128xf32>
    %126 = arith.mulf %119, %125 : vector<32x128xf32>
    %c0_48 = arith.constant 0 : index
    %c0_49 = arith.constant 0 : index
    %127 = vector.load %arg10[%c0_48, %c0_49] : memref<1x128xf32, #tpu.memory_space<vmem>>, vector<1x128xf32>
    %128 = vector.broadcast %127 : vector<1x128xf32> to vector<32x128xf32>
    %129 = arith.mulf %126, %128 : vector<32x128xf32>
    %c0_50 = arith.constant 0 : index
    %c0_51 = arith.constant 0 : index
    %130 = vector.load %arg11[%c0_50, %c0_51] : memref<1x128xf32, #tpu.memory_space<vmem>>, vector<1x128xf32>
    %131 = vector.broadcast %130 : vector<1x128xf32> to vector<32x128xf32>
    %132 = arith.addf %129, %131 : vector<32x128xf32>
    %cst_52 = arith.constant 0.000000e+00 : f32
    %133 = vector.broadcast %cst_52 : f32 to vector<32x128xf32>
    %134 = arith.cmpf oge, %132, %133 : vector<32x128xf32>
    %cst_53 = arith.constant 0.00999999977 : f32
    %135 = vector.broadcast %cst_53 : f32 to vector<32x128xf32>
    %136 = arith.mulf %135, %132 : vector<32x128xf32>
    %137 = arith.select %134, %132, %136 : vector<32x128xi1>, vector<32x128xf32>
    %138 = arith.truncf %137 : vector<32x128xf32> to vector<32x128xbf16>
    %c0_54 = arith.constant 0 : index
    %c0_55 = arith.constant 0 : index
    %139 = vector.load %arg12[%c0_54, %c0_55] : memref<128x128xbf16, #tpu.memory_space<vmem>>, vector<128x128xbf16>
    %cst_56 = arith.constant dense<0.000000e+00> : vector<32x128xf32>
    %140 = tpu.matmul %138, %139, %cst_56 {dimension_numbers = #tpu.dot_dimension_numbers<[1], [0], [0], [1], [0, 0, 1, 1], [], []>} : vector<32x128xbf16>, vector<128x128xbf16>, vector<32x128xf32> -> vector<32x128xf32>
    %c0_57 = arith.constant 0 : index
    %c0_58 = arith.constant 0 : index
    %141 = vector.load %arg13[%c0_57, %c0_58] : memref<1x128xf32, #tpu.memory_space<vmem>>, vector<1x128xf32>
    %142 = vector.broadcast %141 : vector<1x128xf32> to vector<32x128xf32>
    %143 = arith.addf %140, %142 : vector<32x128xf32>
    %cst_59 = arith.constant dense<0.000000e+00> : vector<32xf32>
    %144 = vector.multi_reduction <add>, %143, %cst_59 [1] : vector<32x128xf32> to vector<32xf32>
    %145 = vector.shape_cast %144 : vector<32xf32> to vector<32x1xf32>
    %cst_60 = arith.constant 1.280000e+02 : f32
    %146 = vector.broadcast %cst_60 : f32 to vector<32x1xf32>
    %147 = arith.divf %145, %146 : vector<32x1xf32>
    %148 = arith.mulf %143, %143 : vector<32x128xf32>
    %cst_61 = arith.constant dense<0.000000e+00> : vector<32xf32>
    %149 = vector.multi_reduction <add>, %148, %cst_61 [1] : vector<32x128xf32> to vector<32xf32>
    %150 = vector.shape_cast %149 : vector<32xf32> to vector<32x1xf32>
    %cst_62 = arith.constant 1.280000e+02 : f32
    %151 = vector.broadcast %cst_62 : f32 to vector<32x1xf32>
    %152 = arith.divf %150, %151 : vector<32x1xf32>
    %153 = vector.broadcast %147 : vector<32x1xf32> to vector<32x128xf32>
    %154 = arith.subf %143, %153 : vector<32x128xf32>
    %155 = arith.mulf %147, %147 : vector<32x1xf32>
    %156 = arith.subf %152, %155 : vector<32x1xf32>
    %cst_63 = arith.constant 9.99999974E-6 : f32
    %157 = vector.broadcast %cst_63 : f32 to vector<32x1xf32>
    %158 = arith.addf %156, %157 : vector<32x1xf32>
    %159 = math.rsqrt %158 : vector<32x1xf32>
    %160 = vector.broadcast %159 : vector<32x1xf32> to vector<32x128xf32>
    %161 = arith.mulf %154, %160 : vector<32x128xf32>
    %c0_64 = arith.constant 0 : index
    %c0_65 = arith.constant 0 : index
    %162 = vector.load %arg14[%c0_64, %c0_65] : memref<1x128xf32, #tpu.memory_space<vmem>>, vector<1x128xf32>
    %163 = vector.broadcast %162 : vector<1x128xf32> to vector<32x128xf32>
    %164 = arith.mulf %161, %163 : vector<32x128xf32>
    %c0_66 = arith.constant 0 : index
    %c0_67 = arith.constant 0 : index
    %165 = vector.load %arg15[%c0_66, %c0_67] : memref<1x128xf32, #tpu.memory_space<vmem>>, vector<1x128xf32>
    %166 = vector.broadcast %165 : vector<1x128xf32> to vector<32x128xf32>
    %167 = arith.addf %164, %166 : vector<32x128xf32>
    %cst_68 = arith.constant 0.000000e+00 : f32
    %168 = vector.broadcast %cst_68 : f32 to vector<32x128xf32>
    %169 = arith.cmpf oge, %167, %168 : vector<32x128xf32>
    %cst_69 = arith.constant 0.00999999977 : f32
    %170 = vector.broadcast %cst_69 : f32 to vector<32x128xf32>
    %171 = arith.mulf %170, %167 : vector<32x128xf32>
    %172 = arith.select %169, %167, %171 : vector<32x128xi1>, vector<32x128xf32>
    %c0_70 = arith.constant 0 : index
    %c0_71 = arith.constant 0 : index
    %173 = vector.load %arg16[%c0_70, %c0_71] : memref<32x128xf32, #tpu.memory_space<vmem>>, vector<32x128xf32>
    tpu.vector_store %arg16[%c0_70, %c0_71], %172 {strides = array<i32>} : memref<32x128xf32, #tpu.memory_space<vmem>>, vector<32x128xf32>,
    return
  }
  func.func @transform_0(%arg0: i32) -> (i32, i32) {
    %c0_i32 = arith.constant 0 : i32
    %c0_i32_0 = arith.constant 0 : i32
    return %arg0, %c0_i32 : i32, i32
  }
  func.func @transform_1(%arg0: i32) -> (i32, i32) {
    %c0_i32 = arith.constant 0 : i32
    %c0_i32_0 = arith.constant 0 : i32
    %c0_i32_1 = arith.constant 0 : i32
    return %c0_i32, %c0_i32_0 : i32, i32
  }
  func.func @transform_2(%arg0: i32) -> (i32, i32) {
    %c0_i32 = arith.constant 0 : i32
    %c0_i32_0 = arith.constant 0 : i32
    %c0_i32_1 = arith.constant 0 : i32
    return %c0_i32, %c0_i32_0 : i32, i32
  }
  func.func @transform_3(%arg0: i32) -> (i32, i32) {
    %c0_i32 = arith.constant 0 : i32
    %c0_i32_0 = arith.constant 0 : i32
    %c0_i32_1 = arith.constant 0 : i32
    return %c0_i32, %c0_i32_0 : i32, i32
  }
  func.func @transform_4(%arg0: i32) -> (i32, i32) {
    %c0_i32 = arith.constant 0 : i32
    %c0_i32_0 = arith.constant 0 : i32
    %c0_i32_1 = arith.constant 0 : i32
    return %c0_i32, %c0_i32_0 : i32, i32
  }
  func.func @transform_5(%arg0: i32) -> (i32, i32) {
    %c0_i32 = arith.constant 0 : i32
    %c0_i32_0 = arith.constant 0 : i32
    %c0_i32_1 = arith.constant 0 : i32
    return %c0_i32, %c0_i32_0 : i32, i32
  }
  func.func @transform_6(%arg0: i32) -> (i32, i32) {
    %c0_i32 = arith.constant 0 : i32
    %c0_i32_0 = arith.constant 0 : i32
    %c0_i32_1 = arith.constant 0 : i32
    return %c0_i32, %c0_i32_0 : i32, i32
  }
  func.func @transform_7(%arg0: i32) -> (i32, i32) {
    %c0_i32 = arith.constant 0 : i32
    %c0_i32_0 = arith.constant 0 : i32
    %c0_i32_1 = arith.constant 0 : i32
    return %c0_i32, %c0_i32_0 : i32, i32
  }
  func.func @transform_8(%arg0: i32) -> (i32, i32) {
    %c0_i32 = arith.constant 0 : i32
    %c0_i32_0 = arith.constant 0 : i32
    %c0_i32_1 = arith.constant 0 : i32
    return %c0_i32, %c0_i32_0 : i32, i32
  }
  func.func @transform_9(%arg0: i32) -> (i32, i32) {
    %c0_i32 = arith.constant 0 : i32
    %c0_i32_0 = arith.constant 0 : i32
    %c0_i32_1 = arith.constant 0 : i32
    return %c0_i32, %c0_i32_0 : i32, i32
  }
  func.func @transform_10(%arg0: i32) -> (i32, i32) {
    %c0_i32 = arith.constant 0 : i32
    %c0_i32_0 = arith.constant 0 : i32
    %c0_i32_1 = arith.constant 0 : i32
    return %c0_i32, %c0_i32_0 : i32, i32
  }
  func.func @transform_11(%arg0: i32) -> (i32, i32) {
    %c0_i32 = arith.constant 0 : i32
    %c0_i32_0 = arith.constant 0 : i32
    %c0_i32_1 = arith.constant 0 : i32
    return %c0_i32, %c0_i32_0 : i32, i32
  }
  func.func @transform_12(%arg0: i32) -> (i32, i32) {
    %c0_i32 = arith.constant 0 : i32
    %c0_i32_0 = arith.constant 0 : i32
    %c0_i32_1 = arith.constant 0 : i32
    return %c0_i32, %c0_i32_0 : i32, i32
  }
  func.func @transform_13(%arg0: i32) -> (i32, i32) {
    %c0_i32 = arith.constant 0 : i32
    %c0_i32_0 = arith.constant 0 : i32
    %c0_i32_1 = arith.constant 0 : i32
    return %c0_i32, %c0_i32_0 : i32, i32
  }
  func.func @transform_14(%arg0: i32) -> (i32, i32) {
    %c0_i32 = arith.constant 0 : i32
    %c0_i32_0 = arith.constant 0 : i32
    %c0_i32_1 = arith.constant 0 : i32
    return %c0_i32, %c0_i32_0 : i32, i32
  }
  func.func @transform_15(%arg0: i32) -> (i32, i32) {
    %c0_i32 = arith.constant 0 : i32
    %c0_i32_0 = arith.constant 0 : i32
    return %arg0, %c0_i32 : i32, i32
  }
}

</mosaic_0001>

<bundles_post_ra>
// kernel: tpu_custom_call.1
= control target key start
LH: loop header
LB: loop body
LE: loop exit
PB: predicated region body
PF: predicated region fallthrough
CT: control target
= control target key end

     0   :  { %s3272_s0 = inlined_call_operand.hbm [shape: bf16[64,128], index: 0, kind: input, shape index: {}]   ;;  %s3273_s1 = inlined_call_operand.hbm [shape: bf16[128,512], index: 1, kind: input, shape index: {}]   ;;  %s3274_s2 = inlined_call_operand.hbm [shape: bf16[384,256], index: 2, kind: input, shape index: {}]   ;;  %s3275_s3 = inlined_call_operand.vmem [shape: f32[1,128], index: 3, kind: input, shape index: {}]   ;;  %s3276_s4 = inlined_call_operand.vmem [shape: f32[1,128], index: 4, kind: input, shape index: {}]   ;;  %s3277_s5 = inlined_call_operand.vmem [shape: f32[1,128], index: 5, kind: input, shape index: {}]   ;;  %s3278_s6 = inlined_call_operand.vmem [shape: f32[1,128], index: 6, kind: input, shape index: {}]   ;;  %s3279_s7 = inlined_call_operand.hbm [shape: bf16[128,128], index: 7, kind: input, shape index: {}]   ;;  %s3280_s8 = inlined_call_operand.vmem [shape: f32[1,128], index: 8, kind: input, shape index: {}]   ;;  %s3281_s9 = inlined_call_operand.vmem [shape: f32[1,128], index: 9, kind: input, shape index: {}]   ;;  %s3282_s10 = inlined_call_operand.vmem [shape: f32[1,128], index: 10, kind: input, shape index: {}]   ;;  %s3283_s11 = inlined_call_operand.hbm [shape: bf16[128,128], index: 11, kind: input, shape index: {}]   ;;  %s3284_s12 = inlined_call_operand.vmem [shape: f32[1,128], index: 12, kind: input, shape index: {}]   ;;  %s3285_s13 = inlined_call_operand.vmem [shape: f32[1,128], index: 13, kind: input, shape index: {}]   ;;  %s3286_s14 = inlined_call_operand.vmem [shape: f32[1,128], index: 14, kind: input, shape index: {}]   ;;  %s3287_s15 = inlined_call_operand.hbm [shape: f32[64,128], index: 15, kind: output, shape index: {}]  }
   0x1   :  { %3301 = sst [smem:[#allocation21_spill]] %s3273_s1 }
   0x2   :  { %3302 = sst [smem:[#allocation22_spill]] %s3274_s2 }
   0x3   :  { %3303 = sst [smem:[#allocation23_spill]] %s3279_s7 }
   0x4   :  { %3304 = sst [smem:[#allocation24_spill]] %s3283_s11 }
   0x5   :  { %3305 = sst [smem:[#allocation25_spill]] %s3287_s15 }
   0x6   :  { %20 = vsyncpa [#allocation3], 0 }
   0x7   :  { %22 = vsyncpa [#allocation3 + $0x1], 0 }
   0x8   :  { %23 = vsyncpa [#allocation6], 0 }
   0x9   :  { %24 = vsyncpa [#allocation9], 0 }
   0xa   :  { %25 = vsyncpa [#allocation4], 0 }
   0xb   :  { %27 = vsyncpa [#allocation4 + $0x1], 0  ;;  %s2883_s18 = smov 0   ;;  %s2885_s19 = smov 0  }
   0xc   :  { %s2887_s20 = smov 0   ;;  %s2889_s21 = smov 0  }
   0xd LB: > { %3306 = sst [smem:[#allocation16_spill]] %s2773_s18  ;;  %s2904_s22 = sadd.s32 4294967295, %s2785_s21   ;;  %s2785_s21 = sphi %s2889_s21, %s3336_s21   ;;  %s2781_s20 = sphi %s2887_s20, %s3338_s20   ;;  %s2777_s19 = sphi %s2885_s19, %s3340_s19   ;;  %s2773_s18 = sphi %s2883_s18, %s3339_s18  }
   0xe   : > { %3307 = sst [smem:[#allocation17_spill]] %s2781_s20  ;;  %s2112_s23 = sadd.s32 4294967294, %s2785_s21  }
   0xf   : > { %p53_p0 = scmp.ne.s32.totalorder %s2777_s19, %s2773_s18  ;;  %p3290_p1 = scmp.eq.s32.totalorder %s2904_s22, 0 }
  0x10   : > { %p377_p3 = scmp.eq.s32.totalorder %s2112_s23, 1  ;;  %p2113_p5 = scmp.ge.s32.totalorder %s2785_s21, 1 }
  0x11   : > { %p2913_p4 = por %p3290_p1, %p53_p0  ;;  %p384_p7 = scmp.lt.s32.totalorder %s2785_s21, 3 }
  0x12   : > { %p2918_p6 = por %p377_p3, %p53_p0  ;;  %s2787_s27 = smov [#allocation5]  }
  0x13   : > { %s3308_s24 = scalar_select %p2913_p4, 1, 0 }
  0x14   : > { %s3309_s25 = scalar_select %p2918_p6, 1, 0 }
  0x15   : > { %p2923_p8 = pnand %p2113_p5, %p384_p7  ;;  %s396_s28 = sshll.u32 %s2787_s27, 4  ;;  %s397_s28 = int_to_ptr.vmem [resolvable:$true] %s396_s28 }
  0x16   : > { %3310 = sst [smem:[#allocation18_spill]] %s3309_s25  ;;  %s2788_s30 = smov [#allocation8]  }
  0x17   : > { %s3311_s26 = scalar_select %p2923_p8, 1, 0 }
  0x18   : > { %p2324_p9 = pneg %p2923_p8  ;;  %s434_s16 = sshll.u32 %s2788_s30, 4  ;;  %s435_s16 = int_to_ptr.vmem [resolvable:$true] %s434_s16 }
  0x19   : > { %s2592_s17 = scalar_lea.vmem %s397_s28, 4096  ;;  %p2600_p5 = scmp.lt.s32.totalorder %s397_s28, %s397_s28 }
  0x1a   : > { %p2932_p11 = pnand %p2324_p9, %p3290_p1  ;;  %p2593_p13 = scmp.ne.s32.totalorder %s397_s28, %s2592_s17 }
  0x1b   : > { %p2601_p7 = scmp.lt.s32.totalorder %s2592_s17, %s2592_s17 }
  0x1c   : > { %p2583_p12 = pneg %p2932_p11 }
  0x1d   : > { %p2602_p10 = por %p2601_p7, %p2600_p5 }
  0x1e   : > { %p2595_p0 = pnand %p2593_p13, %p2583_p12 }
  0x20   : > { %p2596_p3 = pneg %p2595_p0 }
  0x22   : > { %p2603_p9 = pnand %p2602_p10, %p2596_p3 }
  0x24   : > { %2606 = shalt.err (!%p2603_p9)
}
  0x25   : > { %s2789_s23 = smov 256   ;;  %s2790_s27 = smov 16  }
  0x26   : > { %s3313_s1 = sld [smem:[#allocation21_spill]]  ;;  %s2618_s18 = scalar_lea.vmem %s435_s16, 1024 }
  0x27   : > { %p2619_p1 = scmp.ne.s32.totalorder %s435_s16, %s2618_s18  ;;  %p2626_p2 = scmp.lt.s32.totalorder %s435_s16, %s435_s16 }
  0x28   : > { %p2627_p6 = scmp.lt.s32.totalorder %s2618_s18, %s2618_s18 }
  0x29   : > { %p2621_p13 = pnand %p2619_p1, %p2583_p12 }
  0x2a   : > { %p2628_p5 = por %p2627_p6, %p2626_p2 }
  0x2b   : > { %p2622_p0 = pneg %p2621_p13 }
  0x2c   : > { %2327 = dma.hbm_to_vmem [thread:$0]  (!%p2932_p11), %s3313_s1, 4096, %s397_s28, [#allocation6], %s2789_s23, %s2789_s23, %s2790_s27  }
  0x2d   : > { %p2629_p10 = pnand %p2628_p5, %p2622_p0 }
  0x2f   : > { %2632 = shalt.err (!%p2629_p10)
}
  0x30   : > { %s3292_s17 = smov 64   ;;  %s3294_s15 = smov 4  }
  0x31   : > { %s3314_s7 = sld [smem:[#allocation23_spill]]  ;;  %s2793_s23 = smov [#allocation7]  }
  0x32   : > { %s409_s27 = sshll.u32 %s2793_s23, 4  ;;  %s410_s27 = int_to_ptr.vmem [resolvable:$true] %s409_s27 }
  0x33   : > { %s2644_s30 = scalar_lea.vmem %s410_s27, 6144  ;;  %p2652_p3 = scmp.lt.s32.totalorder %s410_s27, %s410_s27 }
  0x34   : > { %p2645_p1 = scmp.ne.s32.totalorder %s410_s27, %s2644_s30  ;;  %p2653_p7 = scmp.lt.s32.totalorder %s2644_s30, %s2644_s30 }
  0x36   : > { %p2647_p2 = pnand %p2645_p1, %p2583_p12  ;;  %p2654_p9 = por %p2653_p7, %p2652_p3 }
  0x37   : > { %2333 = dma.hbm_to_vmem [thread:$0]  (!%p2932_p11), %s3314_s7, 1024, %s435_s16, [#allocation9], %s3292_s17, %s3292_s17, %s3294_s15  }
  0x38   : > { %p2648_p6 = pneg %p2647_p2 }
  0x3a   : > { %p2655_p13 = pnand %p2654_p9, %p2648_p6 }
  0x3c   : > { %2658 = shalt.err (!%p2655_p13)
}
  0x3d   : > { %s2794_s18 = smov 128   ;;  %s2795_s1 = smov 8  }
  0x3e   : > { %s3315_s2 = sld [smem:[#allocation22_spill]]  ;;  %s2796_s28 = smov [#allocation10]  }
  0x3f   : > { %s456_s23 = sshll.u32 %s2796_s28, 4  ;;  %s457_s23 = int_to_ptr.vmem [resolvable:$true] %s456_s23 }
  0x40   : > { %s2670_s17 = scalar_lea.vmem %s457_s23, 1024  ;;  %p2678_p1 = scmp.lt.s32.totalorder %s457_s23, %s457_s23 }
  0x41   : > { %p2671_p0 = scmp.ne.s32.totalorder %s457_s23, %s2670_s17  ;;  %p2679_p2 = scmp.lt.s32.totalorder %s2670_s17, %s2670_s17 }
  0x43   : > { %p2673_p5 = pnand %p2671_p0, %p2583_p12  ;;  %p2680_p6 = por %p2679_p2, %p2678_p1 }
  0x44   : > { %2330 = dma.hbm_to_vmem [thread:$0]  (!%p2932_p11), %s3315_s2, 6144, %s410_s27, [#allocation6], %s2794_s18, %s2794_s18, %s2795_s1  }
  0x45   : > { %p2674_p10 = pneg %p2673_p5 }
  0x47   : > { %p2681_p3 = pnand %p2680_p6, %p2674_p10 }
  0x49   : > { %2684 = shalt.err (!%p2681_p3)
}
  0x4a   : > { %s3316_s30 = smov 64   ;;  %s3317_s11 = sld [smem:[#allocation24_spill]] }
  0x4b   : > { %s2977_s17 = sadd.s32 1, %s2785_s21   ;;  %s40_s29 = sadd.s32 1, %s2781_s20 }
  0x4c   : > { %3318 = sst [smem:[#allocation19_spill]] %s2977_s17  ;;  %s37_s18 = ssub.s32 %s2785_s21, %s2977_s17 }
  0x4d   : > { %p47_p12 = scmp.ne.s32.totalorder %s2781_s20, %s2777_s19  ;;  %p38_p7 = scmp.eq.s32.totalorder %s37_s18, 0 }
  0x4e   : > { %p48_p9 = scmp.eq.s32.totalorder %s2785_s21, 0  ;;  %p3319_p13 = scmp.eq.s32.totalorder %s2904_s22, 1 }
  0x4f   : > { %p2349_p5 = scmp.lt.s32.totalorder %s2785_s21, 2  ;;  %s479_s28 = sand.u32 1, %s2781_s20  }
  0x50   : > { %2336 = dma.hbm_to_vmem [thread:$0]  (!%p2932_p11), %s3317_s11, 1024, %s457_s23, [#allocation9], %s3316_s30, %s3316_s30, %s3294_s15  }
  0x51   : > { %p2987_p0 = por %p3319_p13, %p47_p12  ;;  %p49_p10 = por %p48_p9, %p47_p12 }
  0x52   : > { %s2993_s25 = scalar_select %p38_p7, %s2781_s20, %s40_s29  }
  0x53   : > { %s3320_s16 = scalar_select %p2987_p0, 1, 0 }
  0x54   : > { %3321 = sst [smem:[#allocation20_spill]] %s2993_s25  ;;  %s2119_s1 = sshll.u32 %s479_s28, 4 }
  0x55   : > { %s2242_s23 = sshll.u32 %s2785_s21, 8  ;;  %s483_s18 = scalar_lea.vmem [#allocation2], %s2119_s1 }
  0x56   : > { %s3000_s2 = scalar_lea.hbm %s3272_s0, %s2242_s23  ;;  %s490_s7 = sshll.u32 %s483_s18, 4  ;;  %s3002_s7 = int_to_ptr.vmem [resolvable:$true] %s490_s7 }
  0x57   : > { %p3004_p11 = pnand %p2349_p5, %p49_p10  ;;  %s3008_s29 = scalar_lea.sflag [#allocation3], %s479_s28 }
  0x58   : > { %s2685_s25 = scalar_lea.hbm %s3000_s2, 256  ;;  %s2690_s1 = scalar_lea.hbm %s3272_s0, 512 }
  0x59   : > { %p2686_p1 = scmp.ne.s32.totalorder %s3000_s2, %s2685_s25  ;;  %p2687_p2 = pneg %p3004_p11 }
  0x5a   : > { %p2691_p12 = scmp.lt.s32.totalorder %s3000_s2, %s3272_s0  ;;  %p2692_p7 = scmp.lt.s32.totalorder %s2690_s1, %s2685_s25 }
  0x5b   : > { %p2688_p6 = pnand %p2687_p2, %p2686_p1 }
  0x5c   : > { %p2693_p9 = por %p2692_p7, %p2691_p12 }
  0x5d   : > { %p2689_p3 = pneg %p2688_p6 }
  0x5f   : > { %p2694_p13 = pnand %p2693_p9, %p2689_p3 }
  0x61   : > { %2697 = shalt.err (!%p2694_p13)
}
  0x62   : > { %s2698_s28 = scalar_lea.vmem %s3002_s7, 256  ;;  %s2797_s20 = smov [#allocation2]  }
  0x63   : > { %p2699_p5 = scmp.ne.s32.totalorder %s3002_s7, %s2698_s28  ;;  %s2703_s17 = sshll.u32 %s2797_s20, 4  ;;  %s2704_s17 = int_to_ptr.vmem [resolvable:$false] %s2703_s17 }
  0x64   : > { %s2705_s15 = scalar_lea.vmem %s2704_s17, 512  ;;  %p2706_p6 = scmp.lt.s32.totalorder %s3002_s7, %s2704_s17 }
  0x65   : > { %p2701_p10 = pnand %p2699_p5, %p2687_p2  ;;  %p2707_p0 = scmp.lt.s32.totalorder %s2705_s15, %s2698_s28 }
  0x67   : > { %p2702_p1 = pneg %p2701_p10  ;;  %p2708_p4 = por %p2707_p0, %p2706_p6 }
  0x69   : > { %p2709_p8 = pnand %p2708_p4, %p2702_p1 }
  0x6b   : > { %2712 = shalt.err (!%p2709_p8)
}
  0x6c   : > { %s3323_s25 = smov 4   ;;  %p3324_p2 = scmp.ne.s32.totalorder %s3311_s26, 0 }
  0x6d   : > { %2340 = dma.hbm_to_vmem [thread:$0]  (!%p3004_p11), %s3000_s2, 256, %s3002_s7, %s3008_s29, %s3316_s30, %s3316_s30, %s3323_s25  }
  0x6e   : > { %502 = sbr.rel (%p3324_p2) target bundleno = 1884 (0x75c), region = 80  ;;  %s3035_s20 = sand.u32 (!%p3324_p2), 1, %s2777_s19  }
  0x6f   : > { %s2123_s17 = sshll.u32 (!%p3324_p2), %s3035_s20, 4  ;;  %s505_s23 = scalar_lea.sflag (!%p3324_p2), [#allocation3], %s3035_s20 }
  0x70   : > { %s3039_s1 = scalar_lea.vmem (!%p3324_p2), [#allocation2], %s2123_s17  ;;  %p3325_p4 = scmp.ne.s32.totalorder (!%p3324_p2), %s3308_s24, 0 }
  0x73   : > { %2756 = dma.done.wait (%p3325_p4), %s505_s23, 256  }
  0x74   : > { %2758 = vsyncadd (%p3325_p4), %s505_s23, 4294967040  ;;  %p3326_p8 = scmp.eq.s32.totalorder %s2904_s22, 0 }
  0x76   : > { %2760 = dma.done.wait (%p3326_p8), [#allocation6], 10240   ;;  %p3327_p0 = pmov %p3326_p8 }
  0x78   : > { %2762 = vsyncadd (%p3327_p0), [#allocation6], 4294957056  ;;  %p3328_p11 = pmov %p3327_p0 }
  0x79   : > { %p3329_p3 = pmov %p3327_p0 }
  0x7a   : > { %2764 = dma.done.wait (%p3328_p11), [#allocation9], 2048  }
  0x7b   : > { %2766 = vsyncadd (%p3329_p3), [#allocation9], 4294965248  ;;  %v2798_v0 = vmov 0   ;;  %v2401_v1 = vld [vmem:[#allocation5 + $0xe4] ss:$16 sps:$4 sm:$0xff]   ;;  %v3063_v40 = vld [vmem:[%s3039_s1 + $0x8] sm:$0xff]  }
  0x7c   : > { %814 = vmatprep.mubr.bf16.mxu0 %v2798_v0  ;;  %867 = vmatprep.mubr.bf16.mxu1 %v2798_v0  ;;  %v2403_v2 = vld [vmem:[#allocation5 + $0xec] ss:$16 sps:$4 sm:$0xff]   ;;  %v2405_v3 = vld [vmem:[#allocation5 + $0xe0] ss:$16 sps:$4 sm:$0xff]   ;;  %v2406_v4 = vld [vmem:[#allocation5 + $0xe8] ss:$16 sps:$4 sm:$0xff]  }
  0x7d   : > { %782 = vmatprep.subr.bf16.mxu0 %v2401_v1  ;;  %835 = vmatprep.subr.bf16.mxu1 %v2403_v2  ;;  %v2407_v5 = vld [vmem:[#allocation5 + $0xc4] ss:$16 sps:$4 sm:$0xff]   ;;  %v2409_v6 = vld [vmem:[#allocation5 + $0xcc] ss:$16 sps:$4 sm:$0xff]   ;;  %v2411_v7 = vld [vmem:[#allocation5 + $0xc0] ss:$16 sps:$4 sm:$0xff]  }
  0x7e   : > { %783 = vmatpush1.bf16.msra.mxu0 %v2405_v3  ;;  %836 = vmatpush1.bf16.msra.mxu1 %v2406_v4  ;;  %v2412_v8 = vld [vmem:[#allocation5 + $0xc8] ss:$16 sps:$4 sm:$0xff]   ;;  %v2413_v9 = vld [vmem:[#allocation5 + $0xa4] ss:$16 sps:$4 sm:$0xff]   ;;  %v2415_v10 = vld [vmem:[#allocation5 + $0xac] ss:$16 sps:$4 sm:$0xff]  }
  0x7f   : > { %784 = vmatprep.subr.bf16.mxu0 %v2407_v5  ;;  %837 = vmatprep.subr.bf16.mxu1 %v2409_v6  ;;  %v2417_v11 = vld [vmem:[#allocation5 + $0xa0] ss:$16 sps:$4 sm:$0xff]   ;;  %v2418_v12 = vld [vmem:[#allocation5 + $0xa8] ss:$16 sps:$4 sm:$0xff]   ;;  %v2419_v13 = vld [vmem:[#allocation5 + $0x84] ss:$16 sps:$4 sm:$0xff]  }
  0x80   : > { %v2421_v14 = vld [vmem:[#allocation5 + $0x8c] ss:$16 sps:$4 sm:$0xff]   ;;  %v2423_v15 = vld [vmem:[#allocation5 + $0x80] ss:$16 sps:$4 sm:$0xff]   ;;  %v2424_v16 = vld [vmem:[#allocation5 + $0x88] ss:$16 sps:$4 sm:$0xff]  }
  0x81   : > { %v2425_v17 = vld [vmem:[#allocation5 + $0x64] ss:$16 sps:$4 sm:$0xff]   ;;  %v2427_v18 = vld [vmem:[#allocation5 + $0x6c] ss:$16 sps:$4 sm:$0xff]   ;;  %v2429_v19 = vld [vmem:[#allocation5 + $0x60] ss:$16 sps:$4 sm:$0xff]  }
  0x82   : > { %785 = vmatpush1.bf16.msra.mxu0 %v2411_v7  ;;  %838 = vmatpush1.bf16.msra.mxu1 %v2412_v8  ;;  %v2430_v20 = vld [vmem:[#allocation5 + $0x68] ss:$16 sps:$4 sm:$0xff]   ;;  %v2431_v21 = vld [vmem:[#allocation5 + $0x44] ss:$16 sps:$4 sm:$0xff]   ;;  %v2433_v22 = vld [vmem:[#allocation5 + $0x4c] ss:$16 sps:$4 sm:$0xff]  }
  0x83   : > { %786 = vmatprep.subr.bf16.mxu0 %v2413_v9  ;;  %839 = vmatprep.subr.bf16.mxu1 %v2415_v10  ;;  %v2435_v23 = vld [vmem:[#allocation5 + $0x40] ss:$16 sps:$4 sm:$0xff]   ;;  %v2436_v24 = vld [vmem:[#allocation5 + $0x48] ss:$16 sps:$4 sm:$0xff]   ;;  %v2437_v25 = vld [vmem:[#allocation5 + $0x24] ss:$16 sps:$4 sm:$0xff]  }
  0x84   : > { %v2439_v26 = vld [vmem:[#allocation5 + $0x2c] ss:$16 sps:$4 sm:$0xff]   ;;  %v2441_v27 = vld [vmem:[#allocation5 + $0x20] ss:$16 sps:$4 sm:$0xff]   ;;  %v2442_v28 = vld [vmem:[#allocation5 + $0x28] ss:$16 sps:$4 sm:$0xff]  }
  0x85   : > { %v2443_v29 = vld [vmem:[#allocation5 + $0x4] ss:$16 sps:$4 sm:$0xff]   ;;  %v2445_v30 = vld [vmem:[#allocation5 + $0xc] ss:$16 sps:$4 sm:$0xff]   ;;  %v2447_v31 = vld [vmem:[#allocation5] ss:$16 sps:$4 sm:$0xff]  }
  0x86   : > { %787 = vmatpush1.bf16.msra.mxu0 %v2417_v11  ;;  %840 = vmatpush1.bf16.msra.mxu1 %v2418_v12  ;;  %v2448_v32 = vld [vmem:[#allocation5 + $0x8] ss:$16 sps:$4 sm:$0xff]   ;;  %v3056_v33 = vld [vmem:[%s3039_s1] sm:$0xff]   ;;  %s2799_s2 = smov 127   ;;  %vm1392_vm9 = vcmask 1039360   ;;  %s2128_s29 = sshll.u32 %s3035_s20, 5 }
  0x87   : > { %788 = vmatprep.subr.bf16.mxu0 %v2419_v13  ;;  %841 = vmatprep.subr.bf16.mxu1 %v2421_v14  ;;  %v2453_v34 = vld [vmem:[#allocation7 + $0x74] ss:$8 sps:$4 sm:$0xff]   ;;  %v2451_v36 = vld [vmem:[#allocation7 + $0x70] ss:$8 sps:$4 sm:$0xff]   ;;  %v2456_v38 = vld [vmem:[#allocation7 + $0x64] ss:$8 sps:$4 sm:$0xff]   ;;  %v912_v10 = vunpack.c.l.bf16 %v3056_v33  ;;  %v913_v11 = vunpack.c.h.bf16 %v3056_v33 }
  0x88   : > { %v2474_v35 = vld [vmem:[#allocation7 + $0x174] ss:$8 sps:$4 sm:$0xff]   ;;  %v2472_v37 = vld [vmem:[#allocation7 + $0x170] ss:$8 sps:$4 sm:$0xff]   ;;  %v2480_v39 = vld [vmem:[#allocation7 + $0x164] ss:$8 sps:$4 sm:$0xff]  }
  0x89   : > { %v2454_v41 = vld [vmem:[#allocation7 + $0x60] ss:$8 sps:$4 sm:$0xff]   ;;  %v2459_v42 = vld [vmem:[#allocation7 + $0x54] ss:$8 sps:$4 sm:$0xff]   ;;  %v2457_v45 = vld [vmem:[#allocation7 + $0x50] ss:$8 sps:$4 sm:$0xff]   ;;  %v916_v14 = vmul.f32 %v912_v10, %v912_v10 }
  0x8a   : > { %789 = vmatpush1.bf16.msra.mxu0 %v2423_v15  ;;  %842 = vmatpush1.bf16.msra.mxu1 %v2424_v16  ;;  %v2478_v43 = vld [vmem:[#allocation7 + $0x160] ss:$8 sps:$4 sm:$0xff]   ;;  %v2486_v44 = vld [vmem:[#allocation7 + $0x154] ss:$8 sps:$4 sm:$0xff]   ;;  %v2462_v46 = vld [vmem:[#allocation7 + $0x44] ss:$8 sps:$4 sm:$0xff]   ;;  %v917_v15 = vmul.f32 %v913_v11, %v913_v11 }
  0x8b   : > { %790 = vmatprep.subr.bf16.mxu0 %v2425_v17  ;;  %843 = vmatprep.subr.bf16.mxu1 %v2427_v18  ;;  %v2484_v47 = vld [vmem:[#allocation7 + $0x150] ss:$8 sps:$4 sm:$0xff]   ;;  %v2492_v48 = vld [vmem:[#allocation7 + $0x144] ss:$8 sps:$4 sm:$0xff]   ;;  %v2460_v49 = vld [vmem:[#allocation7 + $0x40] ss:$8 sps:$4 sm:$0xff]  }
  0x8c   : > { %v2465_v50 = vld [vmem:[#allocation7 + $0x34] ss:$8 sps:$4 sm:$0xff]   ;;  %v2490_v51 = vld [vmem:[#allocation7 + $0x140] ss:$8 sps:$4 sm:$0xff]   ;;  %v2463_v53 = vld [vmem:[#allocation7 + $0x30] ss:$8 sps:$4 sm:$0xff]  }
  0x8d   : > { %v2498_v52 = vld [vmem:[#allocation7 + $0x134] ss:$8 sps:$4 sm:$0xff]   ;;  %v2496_v54 = vld [vmem:[#allocation7 + $0x130] ss:$8 sps:$4 sm:$0xff]   ;;  %v2468_v55 = vld [vmem:[#allocation7 + $0x24] ss:$8 sps:$4 sm:$0xff]  }
  0x8e   : > { %791 = vmatpush1.bf16.msra.mxu0 %v2429_v19  ;;  %844 = vmatpush1.bf16.msra.mxu1 %v2430_v20  ;;  %v2504_v56 = vld [vmem:[#allocation7 + $0x124] ss:$8 sps:$4 sm:$0xff]   ;;  %v2466_v57 = vld [vmem:[#allocation7 + $0x20] ss:$8 sps:$4 sm:$0xff]   ;;  %v2471_v59 = vld [vmem:[#allocation7 + $0x14] ss:$8 sps:$4 sm:$0xff]   ;;  %v922_v20 = vpack.c.bf16 %v917_v15, %v916_v14 }
  0x8f   : > { %792 = vmatprep.subr.bf16.mxu0 %v2431_v21  ;;  %845 = vmatprep.subr.bf16.mxu1 %v2433_v22  ;;  %v2502_v58 = vld [vmem:[#allocation7 + $0x120] ss:$8 sps:$4 sm:$0xff]   ;;  %v2469_v60 = vld [vmem:[#allocation7 + $0x10] ss:$8 sps:$4 sm:$0xff]   ;;  %v2477_v61 = vld [vmem:[#allocation7 + $0x4] ss:$8 sps:$4 sm:$0xff]  }
  0x90   : > { %v2475_v62 = vld [vmem:[#allocation7] ss:$8 sps:$4 sm:$0xff]   ;;  %v2483_v63 = vld [vmem:[#allocation7 + $0xf4] ss:$8 sps:$4 sm:$0xff]   ;;  %v2481_v1 = vld [vmem:[#allocation7 + $0xf0] ss:$8 sps:$4 sm:$0xff]  }
  0x91   : > { %v2489_v2 = vld [vmem:[#allocation7 + $0xe4] ss:$8 sps:$4 sm:$0xff]   ;;  %v2487_v3 = vld [vmem:[#allocation7 + $0xe0] ss:$8 sps:$4 sm:$0xff]   ;;  %v2495_v4 = vld [vmem:[#allocation7 + $0xd4] ss:$8 sps:$4 sm:$0xff]  }
  0x92   : > { %793 = vmatpush1.bf16.msra.mxu0 %v2435_v23  ;;  %846 = vmatpush1.bf16.msra.mxu1 %v2436_v24  ;;  %v2493_v5 = vld [vmem:[#allocation7 + $0xd0] ss:$8 sps:$4 sm:$0xff]   ;;  %v2501_v6 = vld [vmem:[#allocation7 + $0xc4] ss:$8 sps:$4 sm:$0xff]   ;;  %v2499_v7 = vld [vmem:[#allocation7 + $0xc0] ss:$8 sps:$4 sm:$0xff]   ;;  %v914_v23 = vunpack.c.l.bf16 %v3063_v40  ;;  %v915_v24 = vunpack.c.h.bf16 %v3063_v40 }
  0x93   : > { %794 = vmatprep.subr.bf16.mxu0 %v2437_v25  ;;  %847 = vmatprep.subr.bf16.mxu1 %v2439_v26  ;;  %v2507_v8 = vld [vmem:[#allocation7 + $0xb4] ss:$8 sps:$4 sm:$0xff]   ;;  %v2505_v9 = vld [vmem:[#allocation7 + $0xb0] ss:$8 sps:$4 sm:$0xff]   ;;  %v2513_v16 = vld [vmem:[#allocation7 + $0xa4] ss:$8 sps:$4 sm:$0xff]  }
  0x94   : > { %v2510_v12 = vld [vmem:[#allocation7 + $0x114] ss:$8 sps:$4 sm:$0xff]   ;;  %v2508_v13 = vld [vmem:[#allocation7 + $0x110] ss:$8 sps:$4 sm:$0xff]   ;;  %v2511_v17 = vld [vmem:[#allocation7 + $0xa0] ss:$8 sps:$4 sm:$0xff]  }
  0x95   : > { %v2516_v18 = vld [vmem:[#allocation7 + $0x104] ss:$8 sps:$4 sm:$0xff]   ;;  %v2514_v19 = vld [vmem:[#allocation7 + $0x100] ss:$8 sps:$4 sm:$0xff]   ;;  %v2519_v21 = vld [vmem:[#allocation7 + $0x94] ss:$8 sps:$4 sm:$0xff]  }
  0x96   : > { %795 = vmatpush1.bf16.msra.mxu0 %v2441_v27  ;;  %848 = vmatpush1.bf16.msra.mxu1 %v2442_v28  ;;  %v2517_v22 = vld [vmem:[#allocation7 + $0x90] ss:$8 sps:$4 sm:$0xff]   ;;  %v2522_v25 = vld [vmem:[#allocation7 + $0x84] ss:$8 sps:$4 sm:$0xff]   ;;  %v2520_v26 = vld [vmem:[#allocation7 + $0x80] ss:$8 sps:$4 sm:$0xff]   ;;  %v918_v27 = vmul.f32 %v914_v23, %v914_v23  ;;  %v919_v28 = vmul.f32 %v915_v24, %v915_v24 }
  0x97   : > { %796 = vmatprep.subr.bf16.mxu0 %v2443_v29  ;;  %849 = vmatprep.subr.bf16.mxu1 %v2445_v30  ;;  %s570_s27 = scalar_lea.vmem [#allocation11], %s2128_s29  ;;  %s2243_s18 = sshll.u32 %s2904_s22, 9 }
  0x98   : > { %v925_v29 = vpack.c.bf16 %v919_v28, %v918_v27  ;;  %v1332_v28 = vlaneseq  ;;  %s2001_s28 = sshll.u32 %s570_s27, 4  ;;  %s3330_s17 = sld [smem:[#allocation25_spill]]  ;;  %s3229_s28 = int_to_ptr.vmem [resolvable:$true] %s2001_s28 }
  0x99   : > { %s1988_s22 = scalar_lea.sflag [#allocation4], %s3035_s20  ;;  %s2713_s1 = scalar_lea.vmem %s3229_s28, 512 }
  0x9a   : > { %797 = vmatpush1.bf16.msra.mxu0 %v2447_v31  ;;  %850 = vmatpush1.bf16.msra.mxu1 %v2448_v32  ;;  %p2714_p12 = scmp.ne.s32.totalorder %s3229_s28, %s2713_s1  ;;  %p3331_p7 = scmp.ne.s32.totalorder %s3320_s16, 0 }
  0x9b   : > { %1214 = vmatprep.subr.bf16.mxu0 %v2453_v34  ;;  %1267 = vmatprep.subr.bf16.mxu1 %v2474_v35 }
  0x9c   : > { %p2715_p9 = pnand %p2714_p12, %p3331_p7 }
  0x9d   : > { %815 = vmatmul.mubr.bf16.vlgmr.msra.gmra.mxu0 %v3056_v33  ;;  %868 = vmatmul.mubr.bf16.vlgmr.msra.gmra.mxu1 %v3056_v33 }
  0x9e   : > { %824 = vmatprep.mubr.bf16.mxu0 %v2798_v0  ;;  %877 = vmatprep.mubr.bf16.mxu1 %v2798_v0  ;;  %s3227_s23 = scalar_lea.hbm %s3330_s17, %s2243_s18  ;;  %p2716_p13 = pneg %p2715_p9 }
  0x9f   : > { %1215 = vmatpush1.bf16.msra.mxu0 %v2451_v36  ;;  %1268 = vmatpush1.bf16.msra.mxu1 %v2472_v37 }
  0xa0   : > { %1216 = vmatprep.subr.bf16.mxu0 %v2456_v38  ;;  %1269 = vmatprep.subr.bf16.mxu1 %v2480_v39 }
  0xa3   : > { %1217 = vmatpush1.bf16.msra.mxu0 %v2454_v41  ;;  %1270 = vmatpush1.bf16.msra.mxu1 %v2478_v43 }
  0xa4   : > { %1218 = vmatprep.subr.bf16.mxu0 %v2459_v42  ;;  %1271 = vmatprep.subr.bf16.mxu1 %v2486_v44 }
  0xa5   : > { %825 = vmatmul.mubr.bf16.gmra.mxu0 %v3063_v40  ;;  %878 = vmatmul.mubr.bf16.gmra.mxu1 %v3063_v40 }
  0xa6   : > { %1299 = vmatprep.mubr.bf16.mxu1 %v2798_v0 }
  0xa7   : > { %1219 = vmatpush1.bf16.msra.mxu0 %v2457_v45  ;;  %1272 = vmatpush1.bf16.msra.mxu1 %v2484_v47 }
  0xa8   : > { %1220 = vmatprep.subr.bf16.mxu0 %v2462_v46  ;;  %1273 = vmatprep.subr.bf16.mxu1 %v2492_v48 }
  0xab   : > { %1221 = vmatpush1.bf16.msra.mxu0 %v2460_v49  ;;  %1274 = vmatpush1.bf16.msra.mxu1 %v2490_v51 }
  0xac   : > { %1222 = vmatprep.subr.bf16.mxu0 %v2465_v50  ;;  %1275 = vmatprep.subr.bf16.mxu1 %v2498_v52 }
  0xaf   : > { %1223 = vmatpush1.bf16.msra.mxu0 %v2463_v53  ;;  %1276 = vmatpush1.bf16.msra.mxu1 %v2496_v54 }
  0xb0   : > { %1224 = vmatprep.subr.bf16.mxu0 %v2468_v55  ;;  %1277 = vmatprep.subr.bf16.mxu1 %v2504_v56 }
  0xb3   : > { %1225 = vmatpush1.bf16.msra.mxu0 %v2466_v57  ;;  %1278 = vmatpush1.bf16.msra.mxu1 %v2502_v58 }
  0xb4   : > { %1226 = vmatprep.subr.bf16.mxu0 %v2471_v59  ;;  %1279 = vmatprep.subr.bf16.mxu1 %v2510_v12 }
  0xb7   : > { %1227 = vmatpush1.bf16.msra.mxu0 %v2469_v60  ;;  %1280 = vmatpush1.bf16.msra.mxu1 %v2508_v13 }
  0xb8   : > { %1228 = vmatprep.subr.bf16.mxu0 %v2477_v61  ;;  %1281 = vmatprep.subr.bf16.mxu1 %v2516_v18 }
  0xbb   : > { %1229 = vmatpush1.bf16.msra.mxu0 %v2475_v62  ;;  %1282 = vmatpush1.bf16.msra.mxu1 %v2514_v19 }
  0xbc   : > { %1230 = vmatprep.subr.bf16.mxu0 %v2483_v63 }
  0xbe   : > { %1300 = vmatmul.mubr.bf16.vlgmr.msra.gmra.mxu1 %v922_v20 }
  0xbf   : > { %1231 = vmatpush2.bf16.msra.mxu0 %v2481_v1  ;;  %1309 = vmatprep.mubr.bf16.mxu1 %v2798_v0 }
  0xc0   : > { %1232 = vmatprep.subr.bf16.mxu0 %v2489_v2 }
  0xc3   : > { %1233 = vmatpush2.bf16.msra.mxu0 %v2487_v3 }
  0xc4   : > { %1234 = vmatprep.subr.bf16.mxu0 %v2495_v4 }
  0xc6   : > { %1310 = vmatmul.mubr.bf16.gmra.mxu1 %v925_v29  ;;  %v3073_v29 = vand.u32 127, %v1332_v28 }
  0xc7   : > { %1235 = vmatpush2.bf16.msra.mxu0 %v2493_v5 }
  0xc8   : > { %1236 = vmatprep.subr.bf16.mxu0 %v2501_v6  ;;  %vm1335_vm0 = vcmp.lt.s32.totalorder %v3073_v29, 45  ;;  %vm1397_vm13 = vcmp.ge.s32.totalorder %v3073_v29, 44 }
  0xcb   : > { %1237 = vmatpush2.bf16.msra.mxu0 %v2499_v7 }
  0xcc   : > { %1238 = vmatprep.subr.bf16.mxu0 %v2507_v8 }
  0xcf   : > { %1239 = vmatpush2.bf16.msra.mxu0 %v2505_v9 }
  0xd0   : > { %1240 = vmatprep.subr.bf16.mxu0 %v2513_v16 }
  0xd3   : > { %1241 = vmatpush2.bf16.msra.mxu0 %v2511_v17 }
  0xd4   : > { %1242 = vmatprep.subr.bf16.mxu0 %v2519_v21 }
  0xd7   : > { %1243 = vmatpush2.bf16.msra.mxu0 %v2517_v22 }
  0xd8   : > { %1244 = vmatprep.subr.bf16.mxu0 %v2522_v25 }
  0xdb   : > { %1245 = vmatpush2.bf16.msra.mxu0 %v2520_v26 }
 0x15d   : > { %v816_v30 = vpop.f32.mrf.mxu0  ;;  %v869_v31 = vpop.f32.mrf.mxu1 }
 0x15e   : > { %v888_v40 = vmul.f32 %v816_v30, %v816_v30  ;;  %v896_v41 = vmul.f32 %v869_v31, %v869_v31 }
 0x15f   : > { %v818_v32 = vpop.f32.mrf.mxu0  ;;  %v871_v33 = vpop.f32.mrf.mxu1 }
 0x160   : > { %v889_v36 = vmul.f32 %v818_v32, %v818_v32  ;;  %v897_v37 = vmul.f32 %v871_v33, %v871_v33  ;;  %v904_v50 = vadd.f32 %v896_v41, %v888_v40  ;;  %v3078_v33 = vcvt.s32.f32 %v3073_v29 }
 0x161   : > { %v820_v34 = vpop.f32.mrf.mxu0  ;;  %v873_v35 = vpop.f32.mrf.mxu1 }
 0x162   : > { %v890_v38 = vmul.f32 %v820_v34, %v820_v34  ;;  %v898_v39 = vmul.f32 %v873_v35, %v873_v35  ;;  %v905_v48 = vadd.f32 %v897_v37, %v889_v36 }
 0x163   : > { %v822_v42 = vpop.f32.mrf.mxu0  ;;  %v875_v0 = vpop.f32.mrf.mxu1 }
 0x164   : > { %v891_v43 = vmul.f32 %v822_v42, %v822_v42  ;;  %v899_v44 = vmul.f32 %v875_v0, %v875_v0  ;;  %v906_v45 = vadd.f32 %v898_v39, %v890_v38 }
 0x165   : > { %v826_v46 = vpop.f32.mrf.mxu0  ;;  %v879_v47 = vpop.f32.mrf.mxu1 }
 0x166   : > { %v907_v49 = vadd.f32 %v899_v44, %v891_v43  ;;  %v920_v54 = vpack.c.bf16 %v906_v45, %v904_v50  ;;  %v892_v61 = vmul.f32 %v826_v46, %v826_v46  ;;  %v900_v62 = vmul.f32 %v879_v47, %v879_v47 }
 0x167   : > { %v828_v51 = vpop.f32.mrf.mxu0  ;;  %v881_v52 = vpop.f32.mrf.mxu1 }
 0x168   : > { %v921_v53 = vpack.c.bf16 %v907_v49, %v905_v48  ;;  %v893_v57 = vmul.f32 %v828_v51, %v828_v51  ;;  %v901_v58 = vmul.f32 %v881_v52, %v881_v52  ;;  %v908_v7 = vadd.f32 %v900_v62, %v892_v61 }
 0x169   : > { %v830_v55 = vpop.f32.mrf.mxu0  ;;  %v883_v56 = vpop.f32.mrf.mxu1 }
 0x16a   : > { %v894_v59 = vmul.f32 %v830_v55, %v830_v55  ;;  %v902_v60 = vmul.f32 %v883_v56, %v883_v56  ;;  %1246 = vmatprep.mubr.bf16.mxu0 %v921_v53  ;;  %v909_v5 = vadd.f32 %v901_v58, %v893_v57 }
 0x16b   : > { %v832_v63 = vpop.f32.mrf.mxu0  ;;  %v885_v1 = vpop.f32.mrf.mxu1  ;;  %1247 = vmatmul.mubr.bf16.vlgmr.msra.gmra.mxu0 %v920_v54 }
 0x16c   : > { %v895_v2 = vmul.f32 %v832_v63, %v832_v63  ;;  %v903_v3 = vmul.f32 %v885_v1, %v885_v1  ;;  %v910_v4 = vadd.f32 %v902_v60, %v894_v59 }
 0x16e   : > { %v911_v6 = vadd.f32 %v903_v3, %v895_v2  ;;  %v923_v9 = vpack.c.bf16 %v910_v4, %v908_v7 }
 0x170   : > { %v924_v8 = vpack.c.bf16 %v911_v6, %v909_v5 }
 0x172   : > { %1256 = vmatprep.mubr.bf16.mxu0 %v924_v8 }
 0x173   : > { %1257 = vmatmul.mubr.bf16.gmra.mxu0 %v923_v9 }
 0x17e   : > { %v1301_v10 = vpop.f32.mrf.mxu1 }
 0x180   : > { %v1303_v11 = vpop.f32.mrf.mxu1 }
 0x182   : > { %v1305_v12 = vpop.f32.mrf.mxu1 }
 0x184   : > { %v1307_v14 = vpop.f32.mrf.mxu1 }
 0x186   : > { %v1311_v19 = vpop.f32.mrf.mxu1 }
 0x188   : > { %v1313_v24 = vpop.f32.mrf.mxu1 }
 0x18a   : > { %v1315_v0 = vpop.f32.mrf.mxu1 }
 0x18c   : > { %v1317_v44 = vpop.f32.mrf.mxu1 }
 0x22b   : > { %v1248_v13 = vpop.f32.mrf.mxu0 }
 0x22c   : > { %v1302_v30 = vadd.f32 %v1301_v10, %v1248_v13 }
 0x22d   : > { %v1250_v15 = vpop.f32.mrf.mxu0 }
 0x22e   : > { %v1304_v16 = vadd.f32 %v1303_v11, %v1250_v15 }
 0x22f   : > { %v1252_v17 = vpop.f32.mrf.mxu0 }
 0x230   : > { %v1320_v18 = vmax.f32 %v1304_v16, 1e-05  ;;  %v1306_v34 = vadd.f32 %v1305_v12, %v1252_v17 }
 0x231   : > { %v1254_v20 = vpop.f32.mrf.mxu0 }
 0x232   : > { %2541 = vrcp.f32 %v1320_v18  ;;  %v1308_v21 = vadd.f32 %v1307_v14, %v1254_v20 }
 0x233   : > { %v1258_v22 = vpop.f32.mrf.mxu0 }
 0x234   : > { %v1321_v23 = vmax.f32 %v1308_v21, 1e-05  ;;  %v1312_v38 = vadd.f32 %v1311_v19, %v1258_v22 }
 0x235   : > { %v1260_v25 = vpop.f32.mrf.mxu0 }
 0x236   : > { %2543 = vrcp.f32 %v1321_v23  ;;  %v1314_v26 = vadd.f32 %v1313_v24, %v1260_v25  ;;  %v2211_v24 = vld [vmem:[%s3275_s3] ss:$0 sm:$0xff] }
 0x237   : > { %v1262_v40 = vpop.f32.mrf.mxu0 }
 0x238   : > { %v1322_v27 = vmax.f32 %v1314_v26, 1e-05  ;;  %v1316_v48 = vadd.f32 %v1315_v0, %v1262_v40 }
 0x239   : > { %v1264_v43 = vpop.f32.mrf.mxu0 }
 0x23a   : > { %2545 = vrcp.f32 %v1322_v27  ;;  %v1318_v45 = vadd.f32 %v1317_v44, %v1264_v43  ;;  %v2212_v27 = vld [vmem:[%s3276_s4] ss:$0 sm:$0xff] }
 0x23c   : > { %v1323_v46 = vmax.f32 %v1318_v45, 1e-05 }
 0x23e   : > { %2547 = vrcp.f32 %v1323_v46 }
 0x23f   : > { %v2542_v31 = vpop.eup %2541 }
 0x240   : > { %v3075_v32 = vmul.f32 %v2542_v31, %v1302_v30 }
 0x242   : > { %vm1336_vm1 = vcmp.lt.f32.partialorder %v3075_v32, 0.1 }
 0x243   : > { %v2544_v35 = vpop.eup %2543  ;;  %vm1340_vm2 = vmand %vm1336_vm1, %vm1335_vm0 }
 0x244   : > { %v1344_v36 = vsel %vm1340_vm2, %v3078_v33, 183.0  ;;  %v1327_v37 = vmul.f32 %v2544_v35, %v1306_v34 }
 0x245   : > { %1348 = vmin.xlane.f32.xlu0 %v1344_v36 }
 0x246   : > { %1382 = vrot.lane.b32.xlu1 %v1327_v37, %s2799_s2  ;;  %vm1337_vm3 = vcmp.lt.f32.partialorder %v1327_v37, 0.1 }
 0x247   : > { %v2546_v39 = vpop.eup %2545  ;;  %vm1341_vm4 = vmand %vm1337_vm3, %vm1335_vm0 }
 0x248   : > { %v1345_v41 = vsel %vm1341_vm4, %v3078_v33, 183.0  ;;  %v1329_v42 = vmul.f32 %v2546_v39, %v1312_v38 }
 0x249   : > { %1350 = vmin.xlane.f32.xlu0 %v1345_v41 }
 0x24a   : > { %1384 = vrot.lane.b32.xlu1 %v1329_v42, %s2799_s2  ;;  %vm1338_vm5 = vcmp.lt.f32.partialorder %v1329_v42, 0.1 }
 0x24b   : > { %v2548_v47 = vpop.eup %2547  ;;  %vm1342_vm6 = vmand %vm1338_vm5, %vm1335_vm0 }
 0x24c   : > { %v3089_v49 = vmul.f32 %v2548_v47, %v1316_v48  ;;  %v1346_v50 = vsel %vm1342_vm6, %v3078_v33, 183.0 }
 0x24e   : > { %vm1339_vm7 = vcmp.lt.f32.partialorder %v3089_v49, 0.1 }
 0x24f   : > { %vm1343_vm8 = vmand %vm1339_vm7, %vm1335_vm0 }
 0x250   : > { %v1347_v51 = vsel %vm1343_vm8, %v3078_v33, 183.0 }
 0x25f   : > { %1380 = vrot.lane.b32.xlu0 %v3075_v32, %s2799_s2 }
 0x26e   : > { %1352 = vmin.xlane.f32.xlu1 %v1346_v50 }
 0x272   : > { %1354 = vmin.xlane.f32.xlu1 %v1347_v51 }
 0x283   : > { %1386 = vrot.lane.b32.xlu1 %v3089_v49, %s2799_s2  ;;  %s2800_s2 = smov [#allocation11]  }
 0x284   : > { %s2717_s7 = sshll.u32 %s2800_s2, 4  ;;  %s2718_s7 = int_to_ptr.vmem [resolvable:$false] %s2717_s7 }
 0x285   : > { %s2719_s11 = scalar_lea.vmem %s2718_s7, 1024  ;;  %p2720_p5 = scmp.lt.s32.totalorder %s3229_s28, %s2718_s7 }
 0x286   : > { %p2721_p10 = scmp.lt.s32.totalorder %s2719_s11, %s2713_s1 }
 0x288   : > { %p2722_p1 = por %p2721_p10, %p2720_p5 }
 0x28a   : > { %p2723_p6 = pnand %p2722_p1, %p2716_p13 }
 0x2b8   : > { %v1383_v52 = vpop.permute.xlu1 %1382 }
 0x2b9   : > { %v1394_v53 = vsel %vm1392_vm9, %v1383_v52, %v1327_v37 }
 0x2ba   : > { %v1399_v55 = vsub.f32 %v1394_v53, %v1327_v37 }
 0x2bc   : > { %vm1403_vm12 = vcmp.ge.f32.partialorder %v1399_v55, 0.0  ;;  %v1385_v3 = vpop.permute.xlu1 %1384  ;;  %v2524_v55 = vld [vmem:[#allocation8 + $0x30] sm:$0xff]  }
 0x2bd   : > { %vm1407_vm2 = vmor %vm1397_vm13, %vm1403_vm12  ;;  %v1395_v4 = vsel %vm1392_vm9, %v1385_v3, %v1329_v42 }
 0x2be   : > { %v1400_v5 = vsub.f32 %v1395_v4, %v1329_v42 }
 0x2c0   : > { %vm1404_vm12 = vcmp.ge.f32.partialorder %v1400_v5, 0.0 }
 0x2ce   : > { %v1349_v54 = vpop.xlane.xlu0 %1348 }
 0x2cf   : > { %vm1356_vm10 = vcmp.lt.f32.partialorder %v1349_v54, 183.0 }
 0x2d0   : > { %v1360_v56 = vsel %vm1356_vm10, %v1349_v54, 0.0  ;;  %v2523_v54 = vld [vmem:[#allocation8 + $0x38] sm:$0xff]  }
 0x2d1   : > { %vm1364_vm14 = vcmp.gt.f32.partialorder %v1360_v56, 0.0  ;;  %2264 = vmatprep.subr.bf16.mxu1 %v2523_v54 }
 0x2d2   : > { %v1351_v57 = vpop.xlane.xlu0 %1350  ;;  %v1368_v62 = vsel %vm1364_vm14, %v1360_v56, 48.0  ;;  %2265 = vmatpush3.bf16.msra.mxu1 %v2523_v54  ;;  %v2525_v56 = vld [vmem:[#allocation8 + $0x28] sm:$0xff]  }
 0x2d3   : > { %vm1357_vm11 = vcmp.lt.f32.partialorder %v1351_v57, 183.0  ;;  %vm1372_vm6 = vcmp.ge.f32.partialorder %v3078_v33, %v1368_v62  ;;  %2266 = vmatprep.subr.bf16.mxu1 %v2524_v55 }
 0x2d4   : > { %v1361_v58 = vsel %vm1357_vm11, %v1351_v57, 0.0  ;;  %v2526_v57 = vld [vmem:[#allocation8 + $0x20] sm:$0xff]  }
 0x2d5   : > { %vm1365_vm15 = vcmp.gt.f32.partialorder %v1361_v58, 0.0 }
 0x2d6   : > { %v1369_v59 = vsel %vm1365_vm15, %v1361_v58, 48.0  ;;  %v1381_v60 = vpop.permute.xlu0 %1380  ;;  %2267 = vmatpush3.bf16.msra.mxu1 %v2524_v55  ;;  %v2527_v58 = vld [vmem:[#allocation8 + $0x18] sm:$0xff]  }
 0x2d7   : > { %v1393_v61 = vsel %vm1392_vm9, %v1381_v60, %v3075_v32  ;;  %vm1373_vm1 = vcmp.ge.f32.partialorder %v3078_v33, %v1369_v59  ;;  %2268 = vmatprep.subr.bf16.mxu1 %v2525_v56  ;;  %v2528_v59 = vld [vmem:[#allocation8 + $0x10] sm:$0xff]   ;;  %v2529_v60 = vld [vmem:[#allocation8 + $0x8] sm:$0xff]  }
 0x2d8   : > { %v1398_v63 = vsub.f32 %v1393_v61, %v3075_v32  ;;  %vm1411_vm3 = vmand %vm1373_vm1, %vm1407_vm2  ;;  %v2530_v61 = vld [vmem:[#allocation8] sm:$0xff]  }
 0x2d9   : > { %vm1415_vm4 = vmand %vm1411_vm3, %vm1335_vm0 }
 0x2da   : > { %vm1402_vm5 = vcmp.ge.f32.partialorder %v1398_v63, 0.0  ;;  %v1419_v1 = vsel %vm1415_vm4, %v3078_v33, 183.0  ;;  %vm1408_vm2 = vmor %vm1397_vm13, %vm1404_vm12  ;;  %2269 = vmatpush3.bf16.msra.mxu1 %v2525_v56 }
 0x2db   : > { %1424 = vmin.xlane.f32.xlu1 %v1419_v1  ;;  %vm1406_vm7 = vmor %vm1397_vm13, %vm1402_vm5  ;;  %2270 = vmatprep.subr.bf16.mxu1 %v2526_v57 }
 0x2dc   : > { %vm1410_vm8 = vmand %vm1372_vm6, %vm1406_vm7 }
 0x2dd   : > { %vm1414_vm10 = vmand %vm1410_vm8, %vm1335_vm0 }
 0x2de   : > { %v1418_v2 = vsel %vm1414_vm10, %v3078_v33, 183.0  ;;  %2271 = vmatpush3.bf16.msra.mxu1 %v2526_v57 }
 0x2df   : > { %1422 = vmin.xlane.f32.xlu0 %v1418_v2  ;;  %2272 = vmatprep.subr.bf16.mxu1 %v2527_v58 }
 0x2e2   : > { %2273 = vmatpush3.bf16.msra.mxu1 %v2527_v58 }
 0x2e3   : > { %2274 = vmatprep.subr.bf16.mxu1 %v2528_v59 }
 0x2e6   : > { %2275 = vmatpush3.bf16.msra.mxu1 %v2528_v59 }
 0x2e7   : > { %2276 = vmatprep.subr.bf16.mxu1 %v2529_v60 }
 0x2ea   : > { %2277 = vmatpush3.bf16.msra.mxu1 %v2529_v60 }
 0x2eb   : > { %2278 = vmatprep.subr.bf16.mxu1 %v2530_v61 }
 0x2ee   : > { %2279 = vmatpush3.bf16.msra.mxu1 %v2530_v61 }
 0x2f7   : > { %v1353_v6 = vpop.xlane.xlu1 %1352 }
 0x2f8   : > { %vm1358_vm11 = vcmp.lt.f32.partialorder %v1353_v6, 183.0 }
 0x2f9   : > { %v1362_v7 = vsel %vm1358_vm11, %v1353_v6, 0.0 }
 0x2fa   : > { %vm1366_vm14 = vcmp.gt.f32.partialorder %v1362_v7, 0.0 }
 0x2fb   : > { %v1370_v8 = vsel %vm1366_vm14, %v1362_v7, 48.0  ;;  %v1355_v9 = vpop.xlane.xlu1 %1354 }
 0x2fc   : > { %vm1359_vm15 = vcmp.lt.f32.partialorder %v1355_v9, 183.0  ;;  %vm1374_vm1 = vcmp.ge.f32.partialorder %v3078_v33, %v1370_v8 }
 0x2fd   : > { %v1363_v10 = vsel %vm1359_vm15, %v1355_v9, 0.0  ;;  %vm1412_vm3 = vmand %vm1374_vm1, %vm1408_vm2 }
 0x2fe   : > { %vm1367_vm4 = vcmp.gt.f32.partialorder %v1363_v10, 0.0  ;;  %vm1416_vm5 = vmand %vm1412_vm3, %vm1335_vm0 }
 0x2ff   : > { %v1387_v11 = vpop.permute.xlu1 %1386  ;;  %v1420_v12 = vsel %vm1416_vm5, %v3078_v33, 183.0  ;;  %v1371_v14 = vsel %vm1367_vm4, %v1363_v10, 48.0 }
 0x300   : > { %v1396_v13 = vsel %vm1392_vm9, %v1387_v11, %v3089_v49  ;;  %1426 = vmin.xlane.f32.xlu0 %v1420_v12  ;;  %vm1375_vm7 = vcmp.ge.f32.partialorder %v3078_v33, %v1371_v14 }
 0x301   : > { %v1401_v15 = vsub.f32 %v1396_v13, %v3089_v49 }
 0x303   : > { %vm1405_vm6 = vcmp.ge.f32.partialorder %v1401_v15, 0.0  ;;  %v2213_v15 = vld [vmem:[%s3277_s5] ss:$0 sm:$0xff] }
 0x304   : > { %vm1409_vm8 = vmor %vm1397_vm13, %vm1405_vm6 }
 0x305   : > { %vm1413_vm10 = vmand %vm1375_vm7, %vm1409_vm8 }
 0x306   : > { %vm1417_vm11 = vmand %vm1413_vm10, %vm1335_vm0 }
 0x307   : > { %v1421_v16 = vsel %vm1417_vm11, %v3078_v33, 183.0 }
 0x308   : > { %1428 = vmin.xlane.f32.xlu0 %v1421_v16 }
 0x364   : > { %v1425_v17 = vpop.xlane.xlu1 %1424 }
 0x365   : > { %vm1431_vm12 = vcmp.lt.f32.partialorder %v1425_v17, 183.0 }
 0x366   : > { %v1435_v18 = vsel %vm1431_vm12, %v1425_v17, 0.0  ;;  %v2214_v17 = vld [vmem:[%s3278_s6] ss:$0 sm:$0xff] }
 0x367   : > { %v1439_v19 = vadd.f32 3.0, %v1435_v18  ;;  %vm1443_vm0 = vcmp.gt.f32.partialorder %v1435_v18, 0.0 }
 0x368   : > { %v1423_v20 = vpop.xlane.xlu0 %1422 }
 0x369   : > { %2549 = vrcp.f32 %v1439_v19  ;;  %vm1430_vm9 = vcmp.lt.f32.partialorder %v1423_v20, 183.0 }
 0x36a   : > { %v1434_v21 = vsel %vm1430_vm9, %v1423_v20, 0.0 }
 0x36b   : > { %v1438_v22 = vadd.f32 3.0, %v1434_v21  ;;  %vm1442_vm13 = vcmp.gt.f32.partialorder %v1434_v21, 0.0 }
 0x36d   : > { %2551 = vrcp.f32 %v1438_v22 }
 0x376   : > { %v2550_v23 = vpop.eup %2549 }
 0x377   : > { %v1449_v25 = vmul.f32 4800.0, %v2550_v23 }
 0x379   : > { %v1455_v26 = vsel %vm1443_vm0, %v1449_v25, 0.0 }
 0x37a   : > { %v2552_v28 = vpop.eup %2551  ;;  %v1466_v29 = vmul.f32 %v2211_v24, %v1455_v26 }
 0x37b   : > { %v1447_v30 = vmul.f32 4800.0, %v2552_v28 }
 0x37c   : > { %v3138_v31 = vadd.f32 %v2212_v27, %v1466_v29 }
 0x37d   : > { %v1454_v32 = vsel %vm1442_vm13, %v1447_v30, 0.0 }
 0x37e   : > { %v1465_v33 = vmul.f32 %v2211_v24, %v1454_v32  ;;  %1482 = vadd.xlane.f32.xlu1 %v3138_v31  ;;  %v1494_v35 = vmul.f32 %v3138_v31, %v3138_v31 }
 0x380   : > { %v3141_v34 = vadd.f32 %v2212_v27, %v1465_v33 }
 0x382   : > { %1480 = vadd.xlane.f32.xlu0 %v3141_v34  ;;  %1499 = vadd.xlane.f32.xlu1 %v1494_v35  ;;  %v1493_v36 = vmul.f32 %v3141_v34, %v3141_v34 }
 0x386   : > { %1497 = vadd.xlane.f32.xlu0 %v1493_v36 }
 0x389   : > { %v1427_v37 = vpop.xlane.xlu0 %1426 }
 0x38a   : > { %vm1432_vm14 = vcmp.lt.f32.partialorder %v1427_v37, 183.0 }
 0x38b   : > { %v1436_v38 = vsel %vm1432_vm14, %v1427_v37, 0.0 }
 0x38c   : > { %v1440_v39 = vadd.f32 3.0, %v1436_v38  ;;  %vm1444_vm1 = vcmp.gt.f32.partialorder %v1436_v38, 0.0 }
 0x38e   : > { %2553 = vrcp.f32 %v1440_v39 }
 0x391   : > { %v1429_v40 = vpop.xlane.xlu0 %1428 }
 0x392   : > { %vm1433_vm15 = vcmp.lt.f32.partialorder %v1429_v40, 183.0 }
 0x393   : > { %v1437_v41 = vsel %vm1433_vm15, %v1429_v40, 0.0 }
 0x394   : > { %v1441_v42 = vadd.f32 3.0, %v1437_v41  ;;  %vm1445_vm2 = vcmp.gt.f32.partialorder %v1437_v41, 0.0 }
 0x396   : > { %2555 = vrcp.f32 %v1441_v42 }
 0x39b   : > { %v2554_v0 = vpop.eup %2553 }
 0x39c   : > { %v1451_v43 = vmul.f32 4800.0, %v2554_v0 }
 0x39e   : > { %v1456_v44 = vsel %vm1444_vm1, %v1451_v43, 0.0 }
 0x39f   : > { %v1467_v45 = vmul.f32 %v2211_v24, %v1456_v44 }
 0x3a1   : > { %v3148_v46 = vadd.f32 %v2212_v27, %v1467_v45 }
 0x3a3   : > { %v2556_v47 = vpop.eup %2555  ;;  %1484 = vadd.xlane.f32.xlu0 %v3148_v46  ;;  %v1495_v49 = vmul.f32 %v3148_v46, %v3148_v46 }
 0x3a4   : > { %v1453_v48 = vmul.f32 4800.0, %v2556_v47 }
 0x3a6   : > { %v1457_v50 = vsel %vm1445_vm2, %v1453_v48, 0.0 }
 0x3a7   : > { %v1468_v51 = vmul.f32 %v2211_v24, %v1457_v50  ;;  %1501 = vadd.xlane.f32.xlu0 %v1495_v49 }
 0x3a9   : > { %v3153_v52 = vadd.f32 %v2212_v27, %v1468_v51 }
 0x3ab   : > { %1486 = vadd.xlane.f32.xlu1 %v3153_v52  ;;  %v1496_v53 = vmul.f32 %v3153_v52, %v3153_v52 }
 0x3af   : > { %1503 = vadd.xlane.f32.xlu1 %v1496_v53 }
 0x407   : > { %v1483_v62 = vpop.xlane.xlu1 %1482 }
 0x408   : > { %v1490_v63 = vmul.f32 0.0078125, %v1483_v62 }
 0x40a   : > { %v1514_v3 = vmul.f32 %v1490_v63, %v1490_v63  ;;  %v1510_v13 = vsub.f32 %v3138_v31, %v1490_v63 }
 0x40b   : > { %v1481_v1 = vpop.xlane.xlu0 %1480  ;;  %v1500_v2 = vpop.xlane.xlu1 %1499 }
 0x40c   : > { %v1489_v4 = vmul.f32 0.0078125, %v1481_v1  ;;  %v1506_v5 = vmul.f32 0.0078125, %v1500_v2 }
 0x40e   : > { %v1518_v6 = vsub.f32 %v1506_v5, %v1514_v3  ;;  %v1513_v8 = vmul.f32 %v1489_v4, %v1489_v4  ;;  %v1509_v18 = vsub.f32 %v3141_v34, %v1489_v4 }
 0x40f   : > { %v1498_v7 = vpop.xlane.xlu0 %1497 }
 0x410   : > { %v1522_v9 = vadd.f32 1e-05, %v1518_v6  ;;  %v1505_v10 = vmul.f32 0.0078125, %v1498_v7 }
 0x412   : > { %2557 = vrsqrt.f32 %v1522_v9  ;;  %v1517_v11 = vsub.f32 %v1505_v10, %v1513_v8  ;;  %v2531_v8 = vld [vmem:[#allocation10 + $0x38] sm:$0xff]   ;;  %v2532_v9 = vld [vmem:[#allocation10 + $0x30] sm:$0xff]   ;;  %v2533_v10 = vld [vmem:[#allocation10 + $0x28] sm:$0xff]  }
 0x413   : > { %2284 = vmatprep.subr.bf16.mxu0 %v2531_v8 }
 0x414   : > { %v1521_v12 = vadd.f32 1e-05, %v1517_v11  ;;  %2285 = vmatpush3.bf16.msra.mxu0 %v2531_v8  ;;  %v2534_v11 = vld [vmem:[#allocation10 + $0x20] sm:$0xff]  }
 0x415   : > { %2286 = vmatprep.subr.bf16.mxu0 %v2532_v9 }
 0x416   : > { %2559 = vrsqrt.f32 %v1521_v12  ;;  %v2535_v12 = vld [vmem:[#allocation10 + $0x18] sm:$0xff]  }
 0x418   : > { %2287 = vmatpush3.bf16.msra.mxu0 %v2532_v9 }
 0x419   : > { %2288 = vmatprep.subr.bf16.mxu0 %v2533_v10 }
 0x41c   : > { %2289 = vmatpush3.bf16.msra.mxu0 %v2533_v10 }
 0x41d   : > { %2290 = vmatprep.subr.bf16.mxu0 %v2534_v11 }
 0x41f   : > { %v2558_v14 = vpop.eup %2557 }
 0x420   : > { %v1530_v16 = vmul.f32 %v2558_v14, %v1510_v13  ;;  %2291 = vmatpush3.bf16.msra.mxu0 %v2534_v11  ;;  %v2536_v13 = vld [vmem:[#allocation10 + $0x10] sm:$0xff]   ;;  %v2537_v14 = vld [vmem:[#allocation10 + $0x8] sm:$0xff]  }
 0x421   : > { %2292 = vmatprep.subr.bf16.mxu0 %v2535_v12 }
 0x422   : > { %v1541_v19 = vmul.f32 %v2213_v15, %v1530_v16 }
 0x423   : > { %v2560_v20 = vpop.eup %2559 }
 0x424   : > { %v1529_v21 = vmul.f32 %v2560_v20, %v1509_v18  ;;  %v1552_v22 = vadd.f32 %v2214_v17, %v1541_v19  ;;  %2293 = vmatpush3.bf16.msra.mxu0 %v2535_v12  ;;  %v2226_v12 = vld [vmem:[%s3284_s12] ss:$0 sm:$0xff] }
 0x425   : > { %2294 = vmatprep.subr.bf16.mxu0 %v2536_v13 }
 0x426   : > { %v1540_v23 = vmul.f32 %v2213_v15, %v1529_v21  ;;  %v1560_v25 = vmul.f32 0.01, %v1552_v22  ;;  %vm1556_vm3 = vcmp.ge.f32.partialorder %v1552_v22, 0.0 }
 0x428   : > { %v1551_v24 = vadd.f32 %v2214_v17, %v1540_v23  ;;  %v1564_v29 = vsel %vm1556_vm3, %v1552_v22, %v1560_v25  ;;  %2295 = vmatpush3.bf16.msra.mxu0 %v2536_v13 }
 0x429   : > { %2296 = vmatprep.subr.bf16.mxu0 %v2537_v14 }
 0x42a   : > { %vm1555_vm4 = vcmp.ge.f32.partialorder %v1551_v24, 0.0  ;;  %v1559_v26 = vmul.f32 0.01, %v1551_v24 }
 0x42c   : > { %v1485_v27 = vpop.xlane.xlu0 %1484  ;;  %v1563_v28 = vsel %vm1555_vm4, %v1551_v24, %v1559_v26  ;;  %2297 = vmatpush3.bf16.msra.mxu0 %v2537_v14 }
 0x42d   : > { %v1491_v30 = vmul.f32 0.0078125, %v1485_v27  ;;  %v1567_v31 = vpack.c.bf16 %v1564_v29, %v1563_v28 }
 0x42f   : > { %2280 = vmatprep.mubr.bf16.mxu1 %v1567_v31  ;;  %v1515_v33 = vmul.f32 %v1491_v30, %v1491_v30  ;;  %v1511_v43 = vsub.f32 %v3148_v46, %v1491_v30  ;;  %v2215_v46 = vld [vmem:[%s3280_s8] ss:$0 sm:$0xff] }
 0x430   : > { %v1502_v32 = vpop.xlane.xlu0 %1501 }
 0x431   : > { %v1507_v35 = vmul.f32 0.0078125, %v1502_v32 }
 0x433   : > { %v1519_v34 = vsub.f32 %v1507_v35, %v1515_v33 }
 0x434   : > { %v1487_v36 = vpop.xlane.xlu1 %1486 }
 0x435   : > { %v1523_v37 = vadd.f32 1e-05, %v1519_v34  ;;  %v1492_v38 = vmul.f32 0.0078125, %v1487_v36 }
 0x437   : > { %2561 = vrsqrt.f32 %v1523_v37  ;;  %v1516_v40 = vmul.f32 %v1492_v38, %v1492_v38  ;;  %v1512_v48 = vsub.f32 %v3153_v52, %v1492_v38 }
 0x438   : > { %v1504_v39 = vpop.xlane.xlu1 %1503 }
 0x439   : > { %v1508_v41 = vmul.f32 0.0078125, %v1504_v39 }
 0x43b   : > { %v1520_v42 = vsub.f32 %v1508_v41, %v1516_v40 }
 0x43d   : > { %v1524_v0 = vadd.f32 1e-05, %v1520_v42 }
 0x43f   : > { %2563 = vrsqrt.f32 %v1524_v0 }
 0x444   : > { %v2562_v44 = vpop.eup %2561 }
 0x445   : > { %v1531_v45 = vmul.f32 %v2562_v44, %v1511_v43 }
 0x447   : > { %v1542_v47 = vmul.f32 %v2213_v15, %v1531_v45  ;;  %v2224_v45 = vld [vmem:[%s3281_s9] ss:$0 sm:$0xff] }
 0x449   : > { %v1553_v51 = vadd.f32 %v2214_v17, %v1542_v47 }
 0x44b   : > { %v1561_v55 = vmul.f32 0.01, %v1553_v51  ;;  %vm1557_vm5 = vcmp.ge.f32.partialorder %v1553_v51, 0.0 }
 0x44c   : > { %v2564_v49 = vpop.eup %2563 }
 0x44d   : > { %v1532_v50 = vmul.f32 %v2564_v49, %v1512_v48  ;;  %v1565_v57 = vsel %vm1557_vm5, %v1553_v51, %v1561_v55  ;;  %v2225_v48 = vld [vmem:[%s3282_s10] ss:$0 sm:$0xff] }
 0x44f   : > { %v1543_v53 = vmul.f32 %v2213_v15, %v1532_v50  ;;  %v2538_v15 = vld [vmem:[#allocation10] sm:$0xff]  }
 0x450   : > { %2298 = vmatprep.subr.bf16.mxu0 %v2538_v15 }
 0x451   : > { %v1554_v54 = vadd.f32 %v2214_v17, %v1543_v53  ;;  %2299 = vmatpush3.bf16.msra.mxu0 %v2538_v15 }
 0x453   : > { %vm1558_vm6 = vcmp.ge.f32.partialorder %v1554_v54, 0.0  ;;  %v1562_v56 = vmul.f32 0.01, %v1554_v54 }
 0x455   : > { %v1566_v58 = vsel %vm1558_vm6, %v1554_v54, %v1562_v56 }
 0x456   : > { %v1568_v59 = vpack.c.bf16 %v1566_v58, %v1565_v57 }
 0x458   : > { %2281 = vmatmul.mubr.bf16.vlgmr.msra.gmra.mxu1 %v1568_v59 }
 0x518   : > { %v2282_v60 = vpop.f32.mrf.mxu1 }
 0x519   : > { %v3171_v61 = vadd.f32 %v2282_v60, %v2215_v46 }
 0x51a   : > { %v1674_v52 = vpop.f32.mrf.mxu1 }
 0x51b   : > { %1693 = vadd.xlane.f32.xlu0 %v3171_v61  ;;  %v3174_v63 = vadd.f32 %v2215_v46, %v1674_v52  ;;  %v1703_v6 = vmul.f32 %v3171_v61, %v3171_v61 }
 0x51c   : > { %v2283_v62 = vpop.f32.mrf.mxu1 }
 0x51d   : > { %v3176_v1 = vadd.f32 %v2283_v62, %v2215_v46  ;;  %v1701_v4 = vmul.f32 %v3174_v63, %v3174_v63 }
 0x51e   : > { %v1677_v2 = vpop.f32.mrf.mxu1 }
 0x51f   : > { %1695 = vadd.xlane.f32.xlu1 %v3176_v1  ;;  %1689 = vadd.xlane.f32.xlu0 %v3174_v63  ;;  %v3180_v3 = vadd.f32 %v2215_v46, %v1677_v2  ;;  %v1704_v7 = vmul.f32 %v3176_v1, %v3176_v1 }
 0x521   : > { %v1702_v5 = vmul.f32 %v3180_v3, %v3180_v3 }
 0x523   : > { %1691 = vadd.xlane.f32.xlu1 %v3180_v3  ;;  %1705 = vadd.xlane.f32.xlu0 %v1701_v4 }
 0x527   : > { %1707 = vadd.xlane.f32.xlu1 %v1702_v5  ;;  %1709 = vadd.xlane.f32.xlu0 %v1703_v6 }
 0x52b   : > { %1711 = vadd.xlane.f32.xlu1 %v1704_v7 }
 0x5a4   : > { %v1694_v16 = vpop.xlane.xlu0 %1693 }
 0x5a5   : > { %v1699_v20 = vmul.f32 0.0078125, %v1694_v16 }
 0x5a7   : > { %v1723_v27 = vmul.f32 %v1699_v20, %v1699_v20  ;;  %v1719_v53 = vsub.f32 %v3171_v61, %v1699_v20 }
 0x5a8   : > { %v1696_v17 = vpop.xlane.xlu1 %1695  ;;  %v1690_v18 = vpop.xlane.xlu0 %1689 }
 0x5a9   : > { %v1697_v19 = vmul.f32 0.0078125, %v1690_v18  ;;  %v1700_v28 = vmul.f32 0.0078125, %v1696_v17 }
 0x5ab   : > { %v1721_v23 = vmul.f32 %v1697_v19, %v1697_v19  ;;  %v1724_v38 = vmul.f32 %v1700_v28, %v1700_v28  ;;  %v1717_v43 = vsub.f32 %v3174_v63, %v1697_v19  ;;  %v1720_v58 = vsub.f32 %v3176_v1, %v1700_v28 }
 0x5ac   : > { %v1692_v21 = vpop.xlane.xlu1 %1691  ;;  %v1706_v22 = vpop.xlane.xlu0 %1705 }
 0x5ad   : > { %v1698_v24 = vmul.f32 0.0078125, %v1692_v21  ;;  %v1713_v25 = vmul.f32 0.0078125, %v1706_v22 }
 0x5af   : > { %v1725_v26 = vsub.f32 %v1713_v25, %v1721_v23  ;;  %v1722_v31 = vmul.f32 %v1698_v24, %v1698_v24  ;;  %v1718_v49 = vsub.f32 %v3180_v3, %v1698_v24 }
 0x5b0   : > { %v1708_v29 = vpop.xlane.xlu1 %1707  ;;  %v1710_v30 = vpop.xlane.xlu0 %1709 }
 0x5b1   : > { %v1729_v32 = vadd.f32 1e-05, %v1725_v26  ;;  %v1714_v33 = vmul.f32 0.0078125, %v1708_v29  ;;  %v1715_v35 = vmul.f32 0.0078125, %v1710_v30 }
 0x5b3   : > { %2565 = vrsqrt.f32 %v1729_v32  ;;  %v1726_v34 = vsub.f32 %v1714_v33, %v1722_v31  ;;  %v1727_v36 = vsub.f32 %v1715_v35, %v1723_v27 }
 0x5b4   : > { %v1712_v37 = vpop.xlane.xlu1 %1711 }
 0x5b5   : > { %v1730_v39 = vadd.f32 1e-05, %v1726_v34  ;;  %v1731_v40 = vadd.f32 1e-05, %v1727_v36  ;;  %v1716_v41 = vmul.f32 0.0078125, %v1712_v37 }
 0x5b7   : > { %2567 = vrsqrt.f32 %v1730_v39  ;;  %v1728_v42 = vsub.f32 %v1716_v41, %v1724_v38 }
 0x5b8   : > { %2569 = vrsqrt.f32 %v1731_v40 }
 0x5b9   : > { %v1732_v0 = vadd.f32 1e-05, %v1728_v42 }
 0x5bb   : > { %2571 = vrsqrt.f32 %v1732_v0 }
 0x5c0   : > { %v2566_v44 = vpop.eup %2565 }
 0x5c1   : > { %v1737_v47 = vmul.f32 %v2566_v44, %v1717_v43 }
 0x5c3   : > { %v1748_v50 = vmul.f32 %v2224_v45, %v1737_v47 }
 0x5c4   : > { %v2568_v51 = vpop.eup %2567 }
 0x5c5   : > { %v2570_v54 = vpop.eup %2569  ;;  %v1738_v55 = vmul.f32 %v2568_v51, %v1718_v49  ;;  %v1759_v56 = vadd.f32 %v2225_v48, %v1748_v50 }
 0x5c6   : > { %v1739_v57 = vmul.f32 %v2570_v54, %v1719_v53 }
 0x5c7   : > { %v1749_v59 = vmul.f32 %v2224_v45, %v1738_v55  ;;  %v1767_v63 = vmul.f32 0.01, %v1759_v56  ;;  %vm1763_vm7 = vcmp.ge.f32.partialorder %v1759_v56, 0.0 }
 0x5c8   : > { %v2572_v46 = vpop.eup %2571  ;;  %v1750_v60 = vmul.f32 %v2224_v45, %v1739_v57 }
 0x5c9   : > { %v1740_v52 = vmul.f32 %v2572_v46, %v1720_v58  ;;  %v1760_v62 = vadd.f32 %v2225_v48, %v1749_v59  ;;  %v1771_v5 = vsel %vm1763_vm7, %v1759_v56, %v1767_v63  ;;  %v2235_v56 = vld [vmem:[%s3285_s13] ss:$0 sm:$0xff] }
 0x5ca   : > { %v1761_v2 = vadd.f32 %v2225_v48, %v1750_v60  ;;  %v2236_v58 = vld [vmem:[%s3286_s14] ss:$0 sm:$0xff] }
 0x5cb   : > { %vm1764_vm8 = vcmp.ge.f32.partialorder %v1760_v62, 0.0  ;;  %v1768_v3 = vmul.f32 0.01, %v1760_v62  ;;  %v1751_v4 = vmul.f32 %v2224_v45, %v1740_v52 }
 0x5cc   : > { %v1769_v7 = vmul.f32 0.01, %v1761_v2  ;;  %vm1765_vm10 = vcmp.ge.f32.partialorder %v1761_v2, 0.0 }
 0x5cd   : > { %v1772_v6 = vsel %vm1764_vm8, %v1760_v62, %v1768_v3  ;;  %v1762_v61 = vadd.f32 %v2225_v48, %v1751_v4 }
 0x5ce   : > { %v1775_v8 = vpack.c.bf16 %v1772_v6, %v1771_v5  ;;  %v1773_v1 = vsel %vm1765_vm10, %v1761_v2, %v1769_v7 }
 0x5cf   : > { %vm1766_vm11 = vcmp.ge.f32.partialorder %v1762_v61, 0.0  ;;  %v1770_v9 = vmul.f32 0.01, %v1762_v61 }
 0x5d0   : > { %2300 = vmatprep.mubr.bf16.mxu0 %v1775_v8 }
 0x5d1   : > { %v1774_v10 = vsel %vm1766_vm11, %v1762_v61, %v1770_v9 }
 0x5d2   : > { %v1776_v11 = vpack.c.bf16 %v1774_v10, %v1773_v1 }
 0x5d4   : > { %2301 = vmatmul.mubr.bf16.vlgmr.msra.gmra.mxu0 %v1776_v11 }
 0x694   : > { %v2302_v13 = vpop.f32.mrf.mxu0 }
 0x695   : > { %v3204_v14 = vadd.f32 %v2302_v13, %v2226_v12 }
 0x696   : > { %v1882_v15 = vpop.f32.mrf.mxu0 }
 0x697   : > { %1901 = vadd.xlane.f32.xlu0 %v3204_v14  ;;  %v1883_v17 = vadd.f32 %v2226_v12, %v1882_v15  ;;  %v1911_v23 = vmul.f32 %v3204_v14, %v3204_v14 }
 0x698   : > { %v2303_v16 = vpop.f32.mrf.mxu0 }
 0x699   : > { %v3207_v18 = vadd.f32 %v2303_v16, %v2226_v12  ;;  %v1909_v21 = vmul.f32 %v1883_v17, %v1883_v17 }
 0x69a   : > { %v1885_v19 = vpop.f32.mrf.mxu0 }
 0x69b   : > { %1903 = vadd.xlane.f32.xlu1 %v3207_v18  ;;  %1897 = vadd.xlane.f32.xlu0 %v1883_v17  ;;  %v1886_v20 = vadd.f32 %v2226_v12, %v1885_v19  ;;  %v1912_v24 = vmul.f32 %v3207_v18, %v3207_v18 }
 0x69d   : > { %v1910_v22 = vmul.f32 %v1886_v20, %v1886_v20 }
 0x69f   : > { %1899 = vadd.xlane.f32.xlu1 %v1886_v20  ;;  %1913 = vadd.xlane.f32.xlu0 %v1909_v21 }
 0x6a3   : > { %1915 = vadd.xlane.f32.xlu1 %v1910_v22  ;;  %1917 = vadd.xlane.f32.xlu0 %v1911_v23 }
 0x6a7   : > { %1919 = vadd.xlane.f32.xlu1 %v1912_v24 }
 0x720   : > { %v1902_v25 = vpop.xlane.xlu0 %1901 }
 0x721   : > { %v1907_v29 = vmul.f32 0.0078125, %v1902_v25 }
 0x723   : > { %v1931_v36 = vmul.f32 %v1907_v29, %v1907_v29  ;;  %v1927_v52 = vsub.f32 %v3204_v14, %v1907_v29 }
 0x724   : > { %v1904_v26 = vpop.xlane.xlu1 %1903  ;;  %v1898_v27 = vpop.xlane.xlu0 %1897 }
 0x725   : > { %v1905_v28 = vmul.f32 0.0078125, %v1898_v27  ;;  %v1908_v37 = vmul.f32 0.0078125, %v1904_v26 }
 0x727   : > { %v1929_v32 = vmul.f32 %v1905_v28, %v1905_v28  ;;  %v1932_v47 = vmul.f32 %v1908_v37, %v1908_v37  ;;  %v1925_v54 = vsub.f32 %v1883_v17, %v1905_v28  ;;  %v1928_v4 = vsub.f32 %v3207_v18, %v1908_v37 }
 0x728   : > { %v1900_v30 = vpop.xlane.xlu1 %1899  ;;  %v1914_v31 = vpop.xlane.xlu0 %1913 }
 0x729   : > { %v1906_v33 = vmul.f32 0.0078125, %v1900_v30  ;;  %v1921_v35 = vmul.f32 0.0078125, %v1914_v31 }
 0x72b   : > { %v1933_v34 = vsub.f32 %v1921_v35, %v1929_v32  ;;  %v1930_v40 = vmul.f32 %v1906_v33, %v1906_v33  ;;  %v1926_v59 = vsub.f32 %v1886_v20, %v1906_v33 }
 0x72c   : > { %v1916_v38 = vpop.xlane.xlu1 %1915  ;;  %v1918_v39 = vpop.xlane.xlu0 %1917 }
 0x72d   : > { %v1937_v41 = vadd.f32 1e-05, %v1933_v34  ;;  %v1922_v42 = vmul.f32 0.0078125, %v1916_v38  ;;  %v1923_v0 = vmul.f32 0.0078125, %v1918_v39 }
 0x72f   : > { %2573 = vrsqrt.f32 %v1937_v41  ;;  %v1934_v43 = vsub.f32 %v1922_v42, %v1930_v40  ;;  %v1935_v44 = vsub.f32 %v1923_v0, %v1931_v36 }
 0x730   : > { %v1920_v45 = vpop.xlane.xlu1 %1919 }
 0x731   : > { %v1938_v48 = vadd.f32 1e-05, %v1934_v43  ;;  %v1939_v49 = vadd.f32 1e-05, %v1935_v44  ;;  %v1924_v50 = vmul.f32 0.0078125, %v1920_v45 }
 0x733   : > { %2575 = vrsqrt.f32 %v1938_v48  ;;  %v1936_v51 = vsub.f32 %v1924_v50, %v1932_v47 }
 0x734   : > { %2577 = vrsqrt.f32 %v1939_v49 }
 0x735   : > { %v1940_v53 = vadd.f32 1e-05, %v1936_v51 }
 0x737   : > { %2579 = vrsqrt.f32 %v1940_v53 }
 0x73c   : > { %v2574_v55 = vpop.eup %2573 }
 0x73d   : > { %v1945_v57 = vmul.f32 %v2574_v55, %v1925_v54 }
 0x73f   : > { %v1956_v46 = vmul.f32 %v2235_v56, %v1945_v57 }
 0x740   : > { %v2576_v60 = vpop.eup %2575 }
 0x741   : > { %v2578_v62 = vpop.eup %2577  ;;  %v1967_v63 = vadd.f32 %v2236_v58, %v1956_v46  ;;  %v1946_v2 = vmul.f32 %v2576_v60, %v1926_v59 }
 0x742   : > { %v1947_v3 = vmul.f32 %v2578_v62, %v1927_v52 }
 0x743   : > { %vm1971_vm12 = vcmp.ge.f32.partialorder %v1967_v63, 0.0  ;;  %v1975_v5 = vmul.f32 0.01, %v1967_v63  ;;  %v1957_v6 = vmul.f32 %v2235_v56, %v1946_v2 }
 0x744   : > { %v2580_v61 = vpop.eup %2579  ;;  %v1958_v7 = vmul.f32 %v2235_v56, %v1947_v3 }
 0x745   : > { %v1979_v8 = vsel %vm1971_vm12, %v1967_v63, %v1975_v5  ;;  %v1968_v9 = vadd.f32 %v2236_v58, %v1957_v6  ;;  %v1948_v1 = vmul.f32 %v2580_v61, %v1928_v4 }
 0x746   : > { %v1969_v10 = vadd.f32 %v2236_v58, %v1958_v7  ;;  %1983 = vst [vmem:[%s570_s27] sm:$0xff] %v1979_v8 }
 0x747   : > { %vm1972_vm9 = vcmp.ge.f32.partialorder %v1968_v9, 0.0  ;;  %v1976_v11 = vmul.f32 0.01, %v1968_v9  ;;  %v1959_v12 = vmul.f32 %v2235_v56, %v1948_v1 }
 0x748   : > { %vm1973_vm0 = vcmp.ge.f32.partialorder %v1969_v10, 0.0  ;;  %v1977_v13 = vmul.f32 0.01, %v1969_v10 }
 0x749   : > { %v1980_v14 = vsel %vm1972_vm9, %v1968_v9, %v1976_v11  ;;  %v1970_v15 = vadd.f32 %v2236_v58, %v1959_v12 }
 0x74a   : > { %v1981_v16 = vsel %vm1973_vm0, %v1969_v10, %v1977_v13  ;;  %1984 = vst [vmem:[%s570_s27 + $0x8] sm:$0xff] %v1980_v14 }
 0x74b   : > { %vm1974_vm13 = vcmp.ge.f32.partialorder %v1970_v15, 0.0  ;;  %v1978_v17 = vmul.f32 0.01, %v1970_v15  ;;  %1985 = vst [vmem:[%s570_s27 + $0x10] sm:$0xff] %v1981_v16 }
 0x74d   : > { %v1982_v18 = vsel %vm1974_vm13, %v1970_v15, %v1978_v17 }
 0x74e   : > { %1986 = vst [vmem:[%s570_s27 + $0x18] sm:$0xff] %v1982_v18 }
 0x74f   : > { %2726 = shalt.err (!%p2723_p6)
}
 0x750   : > { %s2727_s24 = scalar_lea.hbm %s3227_s23, 512  ;;  %s2731_s29 = scalar_lea.hbm %s3330_s17, 1024 }
 0x751   : > { %p2728_p2 = scmp.ne.s32.totalorder %s3227_s23, %s2727_s24  ;;  %p2732_p0 = scmp.lt.s32.totalorder %s3227_s23, %s3330_s17 }
 0x752   : > { %p2733_p11 = scmp.lt.s32.totalorder %s2731_s29, %s2727_s24 }
 0x753   : > { %p2729_p4 = pnand %p2728_p2, %p3331_p7 }
 0x754   : > { %p2734_p3 = por %p2733_p11, %p2732_p0 }
 0x755   : > { %p2730_p8 = pneg %p2729_p4 }
 0x757   : > { %p2735_p12 = pnand %p2734_p3, %p2730_p8 }
 0x759   : > { %2738 = shalt.err (!%p2735_p12)
}
 0x75a   : > { %s2801_s15 = smov 128   ;;  %s2802_s25 = smov 8  }
 0x75b   : > { %2322 = dma.vmem_to_hbm [thread:$0]  (%p3331_p7), %s3229_s28, 512, %s3227_s23, %s1988_s22, %s2801_s15, %s2801_s15, %s2802_s25  }
 0x75c PF: > { %s3332_s1 = sld [smem:[#allocation16_spill]]  ;;  %p3335_p13 = scmp.ge.s32.totalorder %s2785_s21, 2 }
 0x75d   : > { %s3333_s2 = sld [smem:[#allocation18_spill]] }
 0x762   : > { %s2016_s7 = sand.u32 1, %s3332_s1  }
 0x763   : > { %p3334_p9 = scmp.ne.s32.totalorder %s3333_s2, 0  ;;  %s2017_s11 = scalar_lea.sflag [#allocation4], %s2016_s7 }
 0x765   : > { %p2342_p5 = pnand %p3335_p13, %p3334_p9 }
 0x767   : > { %p2343_p10 = pneg %p2342_p5 }
 0x769   : > { %2768 = dma.done.wait (%p2343_p10), %s2017_s11, 512  }
 0x76a   : > { %2770 = vsyncadd (%p2343_p10), %s2017_s11, 4294966784  ;;  %s3336_s21 = sld [smem:[#allocation19_spill]]  ;;  %s3339_s18 = smov %s2777_s19 }
 0x76b   : > { %s3337_s24 = sld [smem:[#allocation17_spill]] }
 0x76c   : > { %s3338_s20 = sld [smem:[#allocation20_spill]] }
 0x770   : > { %p30_p1 = scmp.ge.s32.totalorder %s3336_s21, 4  }
 0x771   : > { %s3340_s19 = smov %s3337_s24 }
 0x772   :  { %32 = sbr.rel (!%p30_p1) target bundleno = 13 (0xd), region = 141 }
 0x777   :  { %2022 = vsyncpa [#allocation3], 1 }
 0x778   :  { %2024 = vsyncpa [#allocation3 + $0x1], 1 }
 0x779   :  { %2025 = vsyncpa [#allocation6], 1 }
 0x77a   :  { %2026 = vsyncpa [#allocation9], 1 }
 0x77b   :  { %2027 = vsyncpa [#allocation4], 1 }
 0x77c   :  { %2029 = vsyncpa [#allocation4 + $0x1], 1 }

</bundles_post_ra>
